<compile_context>
chip_gen: v5e
topology: v5e:2x2
jax: 0.10.0
libtpu: 0.0.40
codegen_flags: <defaults>
</compile_context>

<pallas_src>
from functools import partial

import jax
import jax.numpy as jnp
from jax.experimental import pallas as pl
from jax.experimental.pallas import tpu as pltpu

C, H, W = 3, 321, 481
IN_FEATURES = C * H * W          # 463203
ROWS = C * H                     # 963 contiguous rows of length W in the flat view
ROW_BLOCK = 488                  # multiple of 8; splits 963 rows into 488 + 475


def _scale_kernel(x_ref, w_ref, o_ref):
    # LinearWise with bias=False: out = x * weight (elementwise)
    o_ref[...] = x_ref[...] * w_ref[...]


def elementwise_scale_pallas(x2d, w2d):
    """x2d, w2d: (ROWS, W) f32 -> (ROWS, W) f32, out = x * w."""
    grid = (pl.cdiv(ROWS, ROW_BLOCK),)       # = 2; Pallas masks the partial last block
    block = (ROW_BLOCK, W)
    idx = lambda i: (i, 0)
    return pl.pallas_call(
        _scale_kernel,
        out_shape=jax.ShapeDtypeStruct((ROWS, W), x2d.dtype),
        grid=grid,
        in_specs=[
            pl.BlockSpec(block, idx),        # x
            pl.BlockSpec(block, idx),        # weight
        ],
        out_specs=pl.BlockSpec(block, idx),
        input_output_aliases={0: 0},         # output reuses x's HBM buffer
        compiler_params=pltpu.CompilerParams(
            dimension_semantics=("parallel",)  # one block per TensorCore on v7x
        ),
    )(x2d, w2d)


@partial(jax.jit, donate_argnums=(0,))
def net_forward(x, weight2d):
    """Reproduces net.forward: view(B,-1) -> x*weight -> view(1,3,321,481).

    The flatten / final view are layout no-ops for an elementwise scale; the
    kernel runs on a contiguous 2D (963, 481) bitcast of the NCHW tensor and
    the result is viewed back to (1, 3, 321, 481).
    """
    x2d = x.reshape(ROWS, W)                 # metadata-only for contiguous NCHW
    y2d = elementwise_scale_pallas(x2d, weight2d)
    return y2d.reshape(1, C, H, W)


def init_params():
    # LinearWise.reset_parameters: weight.uniform_(1, 1) -> all ones; bias=False.
    # The (N,) parameter is stored pre-reshaped to the flat (963, 481) layout
    # once, outside the forward path.
    return jnp.ones((ROWS, W), dtype=jnp.float32)


if __name__ == "__main__":
    key = jax.random.PRNGKey(0)
    kx, kw = jax.random.split(key)

    # net.forward's final .view(1, 3, 321, 481) forces batch=1 at full spatial size.
    x = jax.random.normal(kx, (1, C, H, W), dtype=jnp.float32)

    # Module-faithful params are all ones (init_params()); use a non-trivial
    # deterministic weight here so the check actually exercises the multiply.
    weight2d = jax.random.uniform(
        kw, (ROWS, W), dtype=jnp.float32, minval=0.5, maxval=1.5
    )

    # Reference computed (and materialized) before the call: x is donated.
    ref = jax.block_until_ready(x * weight2d.reshape(1, C, H, W))

    y = net_forward(x, weight2d)
    y = jax.block_until_ready(y)

    assert y.shape == (1, C, H, W)
    assert jnp.allclose(y, ref, atol=1e-6), "mismatch vs reference"

    print("KERNEL_OK")
</pallas_src>

<mosaic_0001>
module attributes {stable_mosaic.version = 11 : i64} {
  func.func @_scale_kernel(%arg0: i32, %arg1: memref<488x481xf32, #tpu.memory_space<vmem>>, %arg2: memref<488x481xf32, #tpu.memory_space<vmem>>, %arg3: memref<488x481xf32, #tpu.memory_space<vmem>>) attributes {dimension_semantics = [#tpu.dimension_semantics<parallel>], iteration_bounds = array<i64: 2>, scalar_prefetch = 0 : i64, scratch_operands = 0 : i64, tpu.core_type = #tpu.core_type<tc>, window_params = [{transform_indices = @transform_0, window_bounds = array<i64: 488, 481>}, {transform_indices = @transform_1, window_bounds = array<i64: 488, 481>}, {transform_indices = @transform_2, window_bounds = array<i64: 488, 481>}]} {
    %c0 = arith.constant 0 : index
    %c0_0 = arith.constant 0 : index
    %0 = vector.load %arg1[%c0, %c0_0] : memref<488x481xf32, #tpu.memory_space<vmem>>, vector<488x481xf32>
    %c0_1 = arith.constant 0 : index
    %c0_2 = arith.constant 0 : index
    %1 = vector.load %arg2[%c0_1, %c0_2] : memref<488x481xf32, #tpu.memory_space<vmem>>, vector<488x481xf32>
    %2 = arith.mulf %0, %1 : vector<488x481xf32>
    %c0_3 = arith.constant 0 : index
    %c0_4 = arith.constant 0 : index
    %3 = vector.load %arg3[%c0_3, %c0_4] : memref<488x481xf32, #tpu.memory_space<vmem>>, vector<488x481xf32>
    tpu.vector_store %arg3[%c0_3, %c0_4], %2 {strides = array<i32>} : memref<488x481xf32, #tpu.memory_space<vmem>>, vector<488x481xf32>,
    return
  }
  func.func @transform_0(%arg0: i32) -> (i32, i32) {
    %c0_i32 = arith.constant 0 : i32
    %c0_i32_0 = arith.constant 0 : i32
    return %arg0, %c0_i32 : i32, i32
  }
  func.func @transform_1(%arg0: i32) -> (i32, i32) {
    %c0_i32 = arith.constant 0 : i32
    %c0_i32_0 = arith.constant 0 : i32
    return %arg0, %c0_i32 : i32, i32
  }
  func.func @transform_2(%arg0: i32) -> (i32, i32) {
    %c0_i32 = arith.constant 0 : i32
    %c0_i32_0 = arith.constant 0 : i32
    return %arg0, %c0_i32 : i32, i32
  }
}

</mosaic_0001>

<bundles_post_ra>
// kernel: net_forward.1
= control target key start
LH: loop header
LB: loop body
LE: loop exit
PB: predicated region body
PF: predicated region fallthrough
CT: control target
= control target key end

     0   :  { %s1662_s9 = smov 0   ;;  %s1664_s10 = smov 0   ;;  %s2658_s0 = inlined_call_operand.vmem [shape: f32[963,481], index: 0, kind: input, shape index: {}, may-alias: {0,2}]   ;;  %s2659_s1 = inlined_call_operand.vmem [shape: f32[963,481], index: 1, kind: input, shape index: {}]   ;;  %s2660_s2 = inlined_call_operand.vmem [shape: f32[963,481], index: 2, kind: output, shape index: {}, may-alias: {0,2}]  }
   0x1   :  { %s1666_s11 = smov 0  }
   0x2 LB: > { %s1673_s12 = sadd.s32 4294967295, %s1613_s11   ;;  %s1675_s13 = sadd.s32 1, %s1613_s11   ;;  %s1613_s11 = sphi %s1666_s11, %s2671_s11   ;;  %s1609_s10 = sphi %s1664_s10, %s2670_s10   ;;  %s1605_s9 = sphi %s1662_s9, %s2669_s9  }
   0x3   : > { %s68_s14 = ssub.s32 %s1613_s11, %s1675_s13  ;;  %s71_s15 = sadd.s32 1, %s1609_s10 }
   0x4   : > { %p69_p0 = scmp.eq.s32.totalorder %s68_s14, 0  ;;  %p81_p1 = scmp.ne.s32.totalorder %s1609_s10, %s1605_s9 }
   0x5   : > { %p82_p2 = scmp.eq.s32.totalorder %s1673_s12, 1  ;;  %p1440_p3 = scmp.ge.s32.totalorder %s1613_s11, 1 }
   0x6   : > { %s1682_s16 = scalar_select %p69_p0, %s1609_s10, %s71_s15  }
   0x7   : > { %p1684_p4 = por %p82_p2, %p81_p1  ;;  %p146_p5 = scmp.lt.s32.totalorder %s1613_s11, 3 }
   0x9   : > { %p147_p6 = pnand %p1440_p3, %p146_p5 }
   0xa   : > { %s181_s18 = sand.u32 (!%p147_p6), 1, %s1605_s9   ;;  %s1689_s19 = smul.u32 (!%p147_p6), 61, %s1673_s12 }
   0xb   : > { %150 = sbr.rel (%p147_p6) target bundleno = 332 (0x14c), region = 28 }
   0xc   : > { %p190_p7 = scmp.lt.s32.totalorder (!%p147_p6), %s1689_s19, 120  ;;  %s1470_s20 = smul.u32 (!%p147_p6), 1952, %s181_s18 }
   0xe   : > { %s1712_s29 = scalar_lea.vmem (!%p147_p6), [#allocation2], %s1470_s20  }
  0x10   : > { %s191_s21 = scalar_select %p190_p7, %s1689_s19, 120  ;;  %vm959_vm0 = vcmask 793600  }
  0x11   : > { %s1209_s30 = ssub.s32 (%p1684_p4), 121, %s1689_s19  ;;  %s1469_s3 = smul.u32 (%p1684_p4), 1952, %s1673_s12 }
  0x12   : > { %s1462_s22 = sshll.u32 %s191_s21, 5  ;;  %p1210_p8 = scmp.lt.s32.totalorder (%p1684_p4), %s1209_s30, 61 }
  0x13   : > { %s1696_s25 = scalar_lea.vmem %s2658_s0, %s1462_s22  ;;  %s1701_s28 = scalar_lea.vmem %s2659_s1, %s1462_s22 }
  0x14   : > { %v224_v0 = vld [vmem:[%s1696_s25] sm:$0xff]  ;;  %v225_v2 = vld [vmem:[%s1696_s25 + $0x8] sm:$0xff]  ;;  %v226_v5 = vld [vmem:[%s1696_s25 + $0x10] sm:$0xff]  ;;  %s2505_s6 = scalar_lea.vmem (%p1684_p4), %s2660_s2, %s1469_s3  }
  0x15   : > { %v468_v1 = vld [vmem:[%s1701_s28] sm:$0xff]  ;;  %v469_v4 = vld [vmem:[%s1701_s28 + $0x8] sm:$0xff]  ;;  %v470_v6 = vld [vmem:[%s1701_s28 + $0x10] sm:$0xff] }
  0x16   : > { %v712_v3 = vmul.f32 %v468_v1, %v224_v0  ;;  %v713_v7 = vmul.f32 %v469_v4, %v225_v2  ;;  %v714_v8 = vmul.f32 %v470_v6, %v226_v5  ;;  %v227_v9 = vld [vmem:[%s1696_s25 + $0x18] sm:$0xff]  ;;  %v228_v11 = vld [vmem:[%s1696_s25 + $0x20] sm:$0xff]  ;;  %v229_v14 = vld [vmem:[%s1696_s25 + $0x28] sm:$0xff] }
  0x17   : > { %v471_v10 = vld [vmem:[%s1701_s28 + $0x18] sm:$0xff]  ;;  %v472_v13 = vld [vmem:[%s1701_s28 + $0x20] sm:$0xff]  ;;  %v473_v15 = vld [vmem:[%s1701_s28 + $0x28] sm:$0xff] }
  0x18   : > { %956 = vst [vmem:[%s1712_s29] sm:$0xff] %v712_v3  ;;  %v715_v12 = vmul.f32 %v471_v10, %v227_v9  ;;  %v716_v16 = vmul.f32 %v472_v13, %v228_v11  ;;  %v717_v17 = vmul.f32 %v473_v15, %v229_v14  ;;  %v230_v18 = vld [vmem:[%s1696_s25 + $0x30] sm:$0xff]  ;;  %v231_v20 = vld [vmem:[%s1696_s25 + $0x38] sm:$0xff]  ;;  %v232_v23 = vld [vmem:[%s1696_s25 + $0x40] sm:$0xff] }
  0x19   : > { %957 = vst [vmem:[%s1712_s29 + $0x8] sm:$0xff] %v713_v7  ;;  %v474_v19 = vld [vmem:[%s1701_s28 + $0x30] sm:$0xff]  ;;  %v475_v22 = vld [vmem:[%s1701_s28 + $0x38] sm:$0xff]  ;;  %v476_v24 = vld [vmem:[%s1701_s28 + $0x40] sm:$0xff] }
  0x1a   : > { %958 = vst [vmem:[%s1712_s29 + $0x10] sm:$0xff] %v714_v8  ;;  %v718_v21 = vmul.f32 %v474_v19, %v230_v18  ;;  %v719_v25 = vmul.f32 %v475_v22, %v231_v20  ;;  %v233_v26 = vld [vmem:[%s1696_s25 + $0x48] sm:$0xff]  ;;  %v234_v28 = vld [vmem:[%s1696_s25 + $0x50] sm:$0xff]  ;;  %v720_v29 = vmul.f32 %v476_v24, %v232_v23  ;;  %v235_v31 = vld [vmem:[%s1696_s25 + $0x58] sm:$0xff] }
  0x1b   : > { %960 = vst.msk [vmem:[%s1712_s29 + $0x18] sm:$0xff] %vm959_vm0, %v715_v12  ;;  %v477_v27 = vld [vmem:[%s1701_s28 + $0x48] sm:$0xff]  ;;  %v478_v30 = vld [vmem:[%s1701_s28 + $0x50] sm:$0xff]  ;;  %v479_v32 = vld [vmem:[%s1701_s28 + $0x58] sm:$0xff] }
  0x1c   : > { %961 = vst [vmem:[%s1712_s29 + $0x20] sm:$0xff] %v716_v16  ;;  %v721_v33 = vmul.f32 %v477_v27, %v233_v26  ;;  %v236_v34 = vld [vmem:[%s1696_s25 + $0x60] sm:$0xff]  ;;  %v722_v36 = vmul.f32 %v478_v30, %v234_v28  ;;  %v237_v37 = vld [vmem:[%s1696_s25 + $0x68] sm:$0xff]  ;;  %v723_v39 = vmul.f32 %v479_v32, %v235_v31  ;;  %v238_v40 = vld [vmem:[%s1696_s25 + $0x70] sm:$0xff] }
  0x1d   : > { %962 = vst [vmem:[%s1712_s29 + $0x28] sm:$0xff] %v717_v17  ;;  %v480_v35 = vld [vmem:[%s1701_s28 + $0x60] sm:$0xff]  ;;  %v481_v38 = vld [vmem:[%s1701_s28 + $0x68] sm:$0xff]  ;;  %v482_v41 = vld [vmem:[%s1701_s28 + $0x70] sm:$0xff] }
  0x1e   : > { %963 = vst [vmem:[%s1712_s29 + $0x30] sm:$0xff] %v718_v21  ;;  %v724_v42 = vmul.f32 %v480_v35, %v236_v34  ;;  %v239_v43 = vld [vmem:[%s1696_s25 + $0x78] sm:$0xff]  ;;  %v725_v45 = vmul.f32 %v481_v38, %v237_v37  ;;  %v240_v46 = vld [vmem:[%s1696_s25 + $0x80] sm:$0xff]  ;;  %v726_v48 = vmul.f32 %v482_v41, %v238_v40  ;;  %v241_v49 = vld [vmem:[%s1696_s25 + $0x88] sm:$0xff] }
  0x1f   : > { %964 = vst.msk [vmem:[%s1712_s29 + $0x38] sm:$0xff] %vm959_vm0, %v719_v25  ;;  %v483_v44 = vld [vmem:[%s1701_s28 + $0x78] sm:$0xff]  ;;  %v484_v47 = vld [vmem:[%s1701_s28 + $0x80] sm:$0xff]  ;;  %v485_v50 = vld [vmem:[%s1701_s28 + $0x88] sm:$0xff] }
  0x20   : > { %965 = vst [vmem:[%s1712_s29 + $0x40] sm:$0xff] %v720_v29  ;;  %v727_v51 = vmul.f32 %v483_v44, %v239_v43  ;;  %v242_v52 = vld [vmem:[%s1696_s25 + $0x90] sm:$0xff]  ;;  %v728_v54 = vmul.f32 %v484_v47, %v240_v46  ;;  %v243_v55 = vld [vmem:[%s1696_s25 + $0x98] sm:$0xff]  ;;  %v729_v57 = vmul.f32 %v485_v50, %v241_v49  ;;  %v244_v58 = vld [vmem:[%s1696_s25 + $0xa0] sm:$0xff] }
  0x21   : > { %966 = vst [vmem:[%s1712_s29 + $0x48] sm:$0xff] %v721_v33  ;;  %v486_v53 = vld [vmem:[%s1701_s28 + $0x90] sm:$0xff]  ;;  %v487_v56 = vld [vmem:[%s1701_s28 + $0x98] sm:$0xff]  ;;  %v488_v59 = vld [vmem:[%s1701_s28 + $0xa0] sm:$0xff] }
  0x22   : > { %967 = vst [vmem:[%s1712_s29 + $0x50] sm:$0xff] %v722_v36  ;;  %v730_v60 = vmul.f32 %v486_v53, %v242_v52  ;;  %v245_v61 = vld [vmem:[%s1696_s25 + $0xa8] sm:$0xff]  ;;  %v731_v63 = vmul.f32 %v487_v56, %v243_v55  ;;  %v246_v0 = vld [vmem:[%s1696_s25 + $0xb0] sm:$0xff]  ;;  %v732_v2 = vmul.f32 %v488_v59, %v244_v58  ;;  %v247_v3 = vld [vmem:[%s1696_s25 + $0xb8] sm:$0xff] }
  0x23   : > { %968 = vst.msk [vmem:[%s1712_s29 + $0x58] sm:$0xff] %vm959_vm0, %v723_v39  ;;  %v489_v62 = vld [vmem:[%s1701_s28 + $0xa8] sm:$0xff]  ;;  %v490_v1 = vld [vmem:[%s1701_s28 + $0xb0] sm:$0xff]  ;;  %v491_v4 = vld [vmem:[%s1701_s28 + $0xb8] sm:$0xff] }
  0x24   : > { %969 = vst [vmem:[%s1712_s29 + $0x60] sm:$0xff] %v724_v42  ;;  %v733_v5 = vmul.f32 %v489_v62, %v245_v61  ;;  %v248_v6 = vld [vmem:[%s1696_s25 + $0xc0] sm:$0xff]  ;;  %v734_v8 = vmul.f32 %v490_v1, %v246_v0  ;;  %v249_v9 = vld [vmem:[%s1696_s25 + $0xc8] sm:$0xff]  ;;  %v735_v11 = vmul.f32 %v491_v4, %v247_v3  ;;  %v250_v12 = vld [vmem:[%s1696_s25 + $0xd0] sm:$0xff] }
  0x25   : > { %970 = vst [vmem:[%s1712_s29 + $0x68] sm:$0xff] %v725_v45  ;;  %v492_v7 = vld [vmem:[%s1701_s28 + $0xc0] sm:$0xff]  ;;  %v493_v10 = vld [vmem:[%s1701_s28 + $0xc8] sm:$0xff]  ;;  %v494_v13 = vld [vmem:[%s1701_s28 + $0xd0] sm:$0xff] }
  0x26   : > { %971 = vst [vmem:[%s1712_s29 + $0x70] sm:$0xff] %v726_v48  ;;  %v736_v14 = vmul.f32 %v492_v7, %v248_v6  ;;  %v251_v15 = vld [vmem:[%s1696_s25 + $0xd8] sm:$0xff]  ;;  %v737_v17 = vmul.f32 %v493_v10, %v249_v9  ;;  %v252_v18 = vld [vmem:[%s1696_s25 + $0xe0] sm:$0xff]  ;;  %v738_v20 = vmul.f32 %v494_v13, %v250_v12  ;;  %v253_v21 = vld [vmem:[%s1696_s25 + $0xe8] sm:$0xff] }
  0x27   : > { %972 = vst.msk [vmem:[%s1712_s29 + $0x78] sm:$0xff] %vm959_vm0, %v727_v51  ;;  %v495_v16 = vld [vmem:[%s1701_s28 + $0xd8] sm:$0xff]  ;;  %v496_v19 = vld [vmem:[%s1701_s28 + $0xe0] sm:$0xff]  ;;  %v497_v22 = vld [vmem:[%s1701_s28 + $0xe8] sm:$0xff] }
  0x28   : > { %973 = vst [vmem:[%s1712_s29 + $0x80] sm:$0xff] %v728_v54  ;;  %v739_v23 = vmul.f32 %v495_v16, %v251_v15  ;;  %v254_v24 = vld [vmem:[%s1696_s25 + $0xf0] sm:$0xff]  ;;  %v740_v26 = vmul.f32 %v496_v19, %v252_v18  ;;  %v255_v27 = vld [vmem:[%s1696_s25 + $0xf8] sm:$0xff]  ;;  %v741_v29 = vmul.f32 %v497_v22, %v253_v21  ;;  %v256_v30 = vld [vmem:[%s1696_s25 + $0x100] sm:$0xff] }
  0x29   : > { %974 = vst [vmem:[%s1712_s29 + $0x88] sm:$0xff] %v729_v57  ;;  %v498_v25 = vld [vmem:[%s1701_s28 + $0xf0] sm:$0xff]  ;;  %v499_v28 = vld [vmem:[%s1701_s28 + $0xf8] sm:$0xff]  ;;  %v500_v31 = vld [vmem:[%s1701_s28 + $0x100] sm:$0xff] }
  0x2a   : > { %975 = vst [vmem:[%s1712_s29 + $0x90] sm:$0xff] %v730_v60  ;;  %v742_v32 = vmul.f32 %v498_v25, %v254_v24  ;;  %v257_v33 = vld [vmem:[%s1696_s25 + $0x108] sm:$0xff]  ;;  %v743_v35 = vmul.f32 %v499_v28, %v255_v27  ;;  %v258_v36 = vld [vmem:[%s1696_s25 + $0x110] sm:$0xff]  ;;  %v744_v38 = vmul.f32 %v500_v31, %v256_v30  ;;  %v259_v39 = vld [vmem:[%s1696_s25 + $0x118] sm:$0xff] }
  0x2b   : > { %976 = vst.msk [vmem:[%s1712_s29 + $0x98] sm:$0xff] %vm959_vm0, %v731_v63  ;;  %v501_v34 = vld [vmem:[%s1701_s28 + $0x108] sm:$0xff]  ;;  %v502_v37 = vld [vmem:[%s1701_s28 + $0x110] sm:$0xff]  ;;  %v503_v40 = vld [vmem:[%s1701_s28 + $0x118] sm:$0xff] }
  0x2c   : > { %977 = vst [vmem:[%s1712_s29 + $0xa0] sm:$0xff] %v732_v2  ;;  %v745_v41 = vmul.f32 %v501_v34, %v257_v33  ;;  %v260_v42 = vld [vmem:[%s1696_s25 + $0x120] sm:$0xff]  ;;  %v746_v44 = vmul.f32 %v502_v37, %v258_v36  ;;  %v261_v45 = vld [vmem:[%s1696_s25 + $0x128] sm:$0xff]  ;;  %v747_v47 = vmul.f32 %v503_v40, %v259_v39  ;;  %v262_v48 = vld [vmem:[%s1696_s25 + $0x130] sm:$0xff] }
  0x2d   : > { %978 = vst [vmem:[%s1712_s29 + $0xa8] sm:$0xff] %v733_v5  ;;  %v504_v43 = vld [vmem:[%s1701_s28 + $0x120] sm:$0xff]  ;;  %v505_v46 = vld [vmem:[%s1701_s28 + $0x128] sm:$0xff]  ;;  %v506_v49 = vld [vmem:[%s1701_s28 + $0x130] sm:$0xff] }
  0x2e   : > { %979 = vst [vmem:[%s1712_s29 + $0xb0] sm:$0xff] %v734_v8  ;;  %v748_v50 = vmul.f32 %v504_v43, %v260_v42  ;;  %v263_v51 = vld [vmem:[%s1696_s25 + $0x138] sm:$0xff]  ;;  %v749_v53 = vmul.f32 %v505_v46, %v261_v45  ;;  %v264_v54 = vld [vmem:[%s1696_s25 + $0x140] sm:$0xff]  ;;  %v750_v56 = vmul.f32 %v506_v49, %v262_v48  ;;  %v265_v57 = vld [vmem:[%s1696_s25 + $0x148] sm:$0xff] }
  0x2f   : > { %980 = vst.msk [vmem:[%s1712_s29 + $0xb8] sm:$0xff] %vm959_vm0, %v735_v11  ;;  %v507_v52 = vld [vmem:[%s1701_s28 + $0x138] sm:$0xff]  ;;  %v508_v55 = vld [vmem:[%s1701_s28 + $0x140] sm:$0xff]  ;;  %v509_v58 = vld [vmem:[%s1701_s28 + $0x148] sm:$0xff] }
  0x30   : > { %981 = vst [vmem:[%s1712_s29 + $0xc0] sm:$0xff] %v736_v14  ;;  %v751_v59 = vmul.f32 %v507_v52, %v263_v51  ;;  %v266_v60 = vld [vmem:[%s1696_s25 + $0x150] sm:$0xff]  ;;  %v752_v62 = vmul.f32 %v508_v55, %v264_v54  ;;  %v267_v63 = vld [vmem:[%s1696_s25 + $0x158] sm:$0xff]  ;;  %v753_v1 = vmul.f32 %v509_v58, %v265_v57  ;;  %v268_v2 = vld [vmem:[%s1696_s25 + $0x160] sm:$0xff] }
  0x31   : > { %982 = vst [vmem:[%s1712_s29 + $0xc8] sm:$0xff] %v737_v17  ;;  %v510_v61 = vld [vmem:[%s1701_s28 + $0x150] sm:$0xff]  ;;  %v511_v0 = vld [vmem:[%s1701_s28 + $0x158] sm:$0xff]  ;;  %v512_v3 = vld [vmem:[%s1701_s28 + $0x160] sm:$0xff] }
  0x32   : > { %983 = vst [vmem:[%s1712_s29 + $0xd0] sm:$0xff] %v738_v20  ;;  %v754_v4 = vmul.f32 %v510_v61, %v266_v60  ;;  %v269_v5 = vld [vmem:[%s1696_s25 + $0x168] sm:$0xff]  ;;  %v755_v7 = vmul.f32 %v511_v0, %v267_v63  ;;  %v270_v8 = vld [vmem:[%s1696_s25 + $0x170] sm:$0xff]  ;;  %v756_v10 = vmul.f32 %v512_v3, %v268_v2  ;;  %v271_v11 = vld [vmem:[%s1696_s25 + $0x178] sm:$0xff] }
  0x33   : > { %984 = vst.msk [vmem:[%s1712_s29 + $0xd8] sm:$0xff] %vm959_vm0, %v739_v23  ;;  %v513_v6 = vld [vmem:[%s1701_s28 + $0x168] sm:$0xff]  ;;  %v514_v9 = vld [vmem:[%s1701_s28 + $0x170] sm:$0xff]  ;;  %v515_v12 = vld [vmem:[%s1701_s28 + $0x178] sm:$0xff] }
  0x34   : > { %985 = vst [vmem:[%s1712_s29 + $0xe0] sm:$0xff] %v740_v26  ;;  %v757_v13 = vmul.f32 %v513_v6, %v269_v5  ;;  %v272_v14 = vld [vmem:[%s1696_s25 + $0x180] sm:$0xff]  ;;  %v758_v16 = vmul.f32 %v514_v9, %v270_v8  ;;  %v273_v17 = vld [vmem:[%s1696_s25 + $0x188] sm:$0xff]  ;;  %v759_v19 = vmul.f32 %v515_v12, %v271_v11  ;;  %v274_v20 = vld [vmem:[%s1696_s25 + $0x190] sm:$0xff] }
  0x35   : > { %986 = vst [vmem:[%s1712_s29 + $0xe8] sm:$0xff] %v741_v29  ;;  %v516_v15 = vld [vmem:[%s1701_s28 + $0x180] sm:$0xff]  ;;  %v517_v18 = vld [vmem:[%s1701_s28 + $0x188] sm:$0xff]  ;;  %v518_v21 = vld [vmem:[%s1701_s28 + $0x190] sm:$0xff] }
  0x36   : > { %987 = vst [vmem:[%s1712_s29 + $0xf0] sm:$0xff] %v742_v32  ;;  %v760_v22 = vmul.f32 %v516_v15, %v272_v14  ;;  %v275_v23 = vld [vmem:[%s1696_s25 + $0x198] sm:$0xff]  ;;  %v761_v25 = vmul.f32 %v517_v18, %v273_v17  ;;  %v276_v26 = vld [vmem:[%s1696_s25 + $0x1a0] sm:$0xff]  ;;  %v762_v28 = vmul.f32 %v518_v21, %v274_v20  ;;  %v277_v29 = vld [vmem:[%s1696_s25 + $0x1a8] sm:$0xff] }
  0x37   : > { %988 = vst.msk [vmem:[%s1712_s29 + $0xf8] sm:$0xff] %vm959_vm0, %v743_v35  ;;  %v519_v24 = vld [vmem:[%s1701_s28 + $0x198] sm:$0xff]  ;;  %v520_v27 = vld [vmem:[%s1701_s28 + $0x1a0] sm:$0xff]  ;;  %v521_v30 = vld [vmem:[%s1701_s28 + $0x1a8] sm:$0xff] }
  0x38   : > { %989 = vst [vmem:[%s1712_s29 + $0x100] sm:$0xff] %v744_v38  ;;  %v763_v31 = vmul.f32 %v519_v24, %v275_v23  ;;  %v278_v32 = vld [vmem:[%s1696_s25 + $0x1b0] sm:$0xff]  ;;  %v764_v34 = vmul.f32 %v520_v27, %v276_v26  ;;  %v279_v35 = vld [vmem:[%s1696_s25 + $0x1b8] sm:$0xff]  ;;  %v765_v37 = vmul.f32 %v521_v30, %v277_v29  ;;  %v280_v38 = vld [vmem:[%s1696_s25 + $0x1c0] sm:$0xff] }
  0x39   : > { %990 = vst [vmem:[%s1712_s29 + $0x108] sm:$0xff] %v745_v41  ;;  %v522_v33 = vld [vmem:[%s1701_s28 + $0x1b0] sm:$0xff]  ;;  %v523_v36 = vld [vmem:[%s1701_s28 + $0x1b8] sm:$0xff]  ;;  %v524_v39 = vld [vmem:[%s1701_s28 + $0x1c0] sm:$0xff] }
  0x3a   : > { %991 = vst [vmem:[%s1712_s29 + $0x110] sm:$0xff] %v746_v44  ;;  %v766_v40 = vmul.f32 %v522_v33, %v278_v32  ;;  %v281_v41 = vld [vmem:[%s1696_s25 + $0x1c8] sm:$0xff]  ;;  %v767_v43 = vmul.f32 %v523_v36, %v279_v35  ;;  %v282_v44 = vld [vmem:[%s1696_s25 + $0x1d0] sm:$0xff]  ;;  %v768_v46 = vmul.f32 %v524_v39, %v280_v38  ;;  %v527_v48 = vld [vmem:[%s1701_s28 + $0x1d8] sm:$0xff] }
  0x3b   : > { %992 = vst.msk [vmem:[%s1712_s29 + $0x118] sm:$0xff] %vm959_vm0, %v747_v47  ;;  %v525_v42 = vld [vmem:[%s1701_s28 + $0x1c8] sm:$0xff]  ;;  %v526_v45 = vld [vmem:[%s1701_s28 + $0x1d0] sm:$0xff]  ;;  %v283_v47 = vld [vmem:[%s1696_s25 + $0x1d8] sm:$0xff] }
  0x3c   : > { %993 = vst [vmem:[%s1712_s29 + $0x120] sm:$0xff] %v748_v50  ;;  %v769_v49 = vmul.f32 %v525_v42, %v281_v41  ;;  %v284_v50 = vld [vmem:[%s1696_s25 + $0x1e0] sm:$0xff]  ;;  %v770_v52 = vmul.f32 %v526_v45, %v282_v44  ;;  %v529_v54 = vld [vmem:[%s1701_s28 + $0x1e8] sm:$0xff]  ;;  %v771_v55 = vmul.f32 %v527_v48, %v283_v47  ;;  %v530_v57 = vld [vmem:[%s1701_s28 + $0x1f0] sm:$0xff] }
  0x3d   : > { %994 = vst [vmem:[%s1712_s29 + $0x128] sm:$0xff] %v749_v53  ;;  %v528_v51 = vld [vmem:[%s1701_s28 + $0x1e0] sm:$0xff]  ;;  %v285_v53 = vld [vmem:[%s1696_s25 + $0x1e8] sm:$0xff]  ;;  %v531_v60 = vld [vmem:[%s1701_s28 + $0x1f8] sm:$0xff] }
  0x3e   : > { %995 = vst [vmem:[%s1712_s29 + $0x130] sm:$0xff] %v750_v56  ;;  %v286_v56 = vld [vmem:[%s1696_s25 + $0x1f0] sm:$0xff]  ;;  %v772_v58 = vmul.f32 %v528_v51, %v284_v50  ;;  %v773_v61 = vmul.f32 %v529_v54, %v285_v53  ;;  %v532_v63 = vld [vmem:[%s1701_s28 + $0x200] sm:$0xff]  ;;  %v533_v2 = vld [vmem:[%s1701_s28 + $0x208] sm:$0xff] }
  0x3f   : > { %996 = vst.msk [vmem:[%s1712_s29 + $0x138] sm:$0xff] %vm959_vm0, %v751_v59  ;;  %v287_v59 = vld [vmem:[%s1696_s25 + $0x1f8] sm:$0xff]  ;;  %v774_v0 = vmul.f32 %v530_v57, %v286_v56  ;;  %v534_v5 = vld [vmem:[%s1701_s28 + $0x210] sm:$0xff]  ;;  %v536_v11 = vld [vmem:[%s1701_s28 + $0x220] sm:$0xff] }
  0x40   : > { %997 = vst [vmem:[%s1712_s29 + $0x140] sm:$0xff] %v752_v62  ;;  %v288_v62 = vld [vmem:[%s1696_s25 + $0x200] sm:$0xff]  ;;  %v775_v3 = vmul.f32 %v531_v60, %v287_v59  ;;  %v535_v8 = vld [vmem:[%s1701_s28 + $0x218] sm:$0xff]  ;;  %v537_v14 = vld [vmem:[%s1701_s28 + $0x228] sm:$0xff] }
  0x41   : > { %998 = vst [vmem:[%s1712_s29 + $0x148] sm:$0xff] %v753_v1  ;;  %v289_v1 = vld [vmem:[%s1696_s25 + $0x208] sm:$0xff]  ;;  %v776_v6 = vmul.f32 %v532_v63, %v288_v62  ;;  %v538_v17 = vld [vmem:[%s1701_s28 + $0x230] sm:$0xff]  ;;  %v539_v20 = vld [vmem:[%s1701_s28 + $0x238] sm:$0xff] }
  0x42   : > { %999 = vst [vmem:[%s1712_s29 + $0x150] sm:$0xff] %v754_v4  ;;  %v290_v4 = vld [vmem:[%s1696_s25 + $0x210] sm:$0xff]  ;;  %v777_v9 = vmul.f32 %v533_v2, %v289_v1  ;;  %v540_v23 = vld [vmem:[%s1701_s28 + $0x240] sm:$0xff]  ;;  %v541_v26 = vld [vmem:[%s1701_s28 + $0x248] sm:$0xff] }
  0x43   : > { %1000 = vst.msk [vmem:[%s1712_s29 + $0x158] sm:$0xff] %vm959_vm0, %v755_v7  ;;  %v291_v7 = vld [vmem:[%s1696_s25 + $0x218] sm:$0xff]  ;;  %v778_v12 = vmul.f32 %v534_v5, %v290_v4  ;;  %v542_v29 = vld [vmem:[%s1701_s28 + $0x250] sm:$0xff]  ;;  %v544_v35 = vld [vmem:[%s1701_s28 + $0x260] sm:$0xff] }
  0x44   : > { %1001 = vst [vmem:[%s1712_s29 + $0x160] sm:$0xff] %v756_v10  ;;  %v292_v10 = vld [vmem:[%s1696_s25 + $0x220] sm:$0xff]  ;;  %v779_v15 = vmul.f32 %v535_v8, %v291_v7  ;;  %v543_v32 = vld [vmem:[%s1701_s28 + $0x258] sm:$0xff]  ;;  %v545_v38 = vld [vmem:[%s1701_s28 + $0x268] sm:$0xff] }
  0x45   : > { %1002 = vst [vmem:[%s1712_s29 + $0x168] sm:$0xff] %v757_v13  ;;  %v293_v13 = vld [vmem:[%s1696_s25 + $0x228] sm:$0xff]  ;;  %v780_v18 = vmul.f32 %v536_v11, %v292_v10  ;;  %v546_v41 = vld [vmem:[%s1701_s28 + $0x270] sm:$0xff]  ;;  %v547_v44 = vld [vmem:[%s1701_s28 + $0x278] sm:$0xff] }
  0x46   : > { %1003 = vst [vmem:[%s1712_s29 + $0x170] sm:$0xff] %v758_v16  ;;  %v294_v16 = vld [vmem:[%s1696_s25 + $0x230] sm:$0xff]  ;;  %v781_v21 = vmul.f32 %v537_v14, %v293_v13  ;;  %v548_v47 = vld [vmem:[%s1701_s28 + $0x280] sm:$0xff]  ;;  %v549_v50 = vld [vmem:[%s1701_s28 + $0x288] sm:$0xff] }
  0x47   : > { %1004 = vst.msk [vmem:[%s1712_s29 + $0x178] sm:$0xff] %vm959_vm0, %v759_v19  ;;  %v295_v19 = vld [vmem:[%s1696_s25 + $0x238] sm:$0xff]  ;;  %v782_v24 = vmul.f32 %v538_v17, %v294_v16  ;;  %v550_v53 = vld [vmem:[%s1701_s28 + $0x290] sm:$0xff]  ;;  %v552_v59 = vld [vmem:[%s1701_s28 + $0x2a0] sm:$0xff] }
  0x48   : > { %1005 = vst [vmem:[%s1712_s29 + $0x180] sm:$0xff] %v760_v22  ;;  %v296_v22 = vld [vmem:[%s1696_s25 + $0x240] sm:$0xff]  ;;  %v783_v27 = vmul.f32 %v539_v20, %v295_v19  ;;  %v551_v56 = vld [vmem:[%s1701_s28 + $0x298] sm:$0xff]  ;;  %v553_v62 = vld [vmem:[%s1701_s28 + $0x2a8] sm:$0xff] }
  0x49   : > { %1006 = vst [vmem:[%s1712_s29 + $0x188] sm:$0xff] %v761_v25  ;;  %v297_v25 = vld [vmem:[%s1696_s25 + $0x248] sm:$0xff]  ;;  %v784_v30 = vmul.f32 %v540_v23, %v296_v22  ;;  %v554_v1 = vld [vmem:[%s1701_s28 + $0x2b0] sm:$0xff]  ;;  %v555_v4 = vld [vmem:[%s1701_s28 + $0x2b8] sm:$0xff] }
  0x4a   : > { %1007 = vst [vmem:[%s1712_s29 + $0x190] sm:$0xff] %v762_v28  ;;  %v298_v28 = vld [vmem:[%s1696_s25 + $0x250] sm:$0xff]  ;;  %v785_v33 = vmul.f32 %v541_v26, %v297_v25  ;;  %v556_v7 = vld [vmem:[%s1701_s28 + $0x2c0] sm:$0xff]  ;;  %v557_v10 = vld [vmem:[%s1701_s28 + $0x2c8] sm:$0xff] }
  0x4b   : > { %1008 = vst.msk [vmem:[%s1712_s29 + $0x198] sm:$0xff] %vm959_vm0, %v763_v31  ;;  %v299_v31 = vld [vmem:[%s1696_s25 + $0x258] sm:$0xff]  ;;  %v786_v36 = vmul.f32 %v542_v29, %v298_v28  ;;  %v558_v13 = vld [vmem:[%s1701_s28 + $0x2d0] sm:$0xff]  ;;  %v560_v19 = vld [vmem:[%s1701_s28 + $0x2e0] sm:$0xff] }
  0x4c   : > { %1009 = vst [vmem:[%s1712_s29 + $0x1a0] sm:$0xff] %v764_v34  ;;  %v300_v34 = vld [vmem:[%s1696_s25 + $0x260] sm:$0xff]  ;;  %v787_v39 = vmul.f32 %v543_v32, %v299_v31  ;;  %v559_v16 = vld [vmem:[%s1701_s28 + $0x2d8] sm:$0xff]  ;;  %v561_v22 = vld [vmem:[%s1701_s28 + $0x2e8] sm:$0xff] }
  0x4d   : > { %1010 = vst [vmem:[%s1712_s29 + $0x1a8] sm:$0xff] %v765_v37  ;;  %v301_v37 = vld [vmem:[%s1696_s25 + $0x268] sm:$0xff]  ;;  %v788_v42 = vmul.f32 %v544_v35, %v300_v34  ;;  %v562_v25 = vld [vmem:[%s1701_s28 + $0x2f0] sm:$0xff]  ;;  %v563_v28 = vld [vmem:[%s1701_s28 + $0x2f8] sm:$0xff] }
  0x4e   : > { %1011 = vst [vmem:[%s1712_s29 + $0x1b0] sm:$0xff] %v766_v40  ;;  %v302_v40 = vld [vmem:[%s1696_s25 + $0x270] sm:$0xff]  ;;  %v789_v45 = vmul.f32 %v545_v38, %v301_v37  ;;  %v564_v31 = vld [vmem:[%s1701_s28 + $0x300] sm:$0xff]  ;;  %v565_v34 = vld [vmem:[%s1701_s28 + $0x308] sm:$0xff] }
  0x4f   : > { %1012 = vst.msk [vmem:[%s1712_s29 + $0x1b8] sm:$0xff] %vm959_vm0, %v767_v43  ;;  %v303_v43 = vld [vmem:[%s1696_s25 + $0x278] sm:$0xff]  ;;  %v790_v48 = vmul.f32 %v546_v41, %v302_v40  ;;  %v566_v37 = vld [vmem:[%s1701_s28 + $0x310] sm:$0xff] }
  0x50   : > { %1013 = vst [vmem:[%s1712_s29 + $0x1c0] sm:$0xff] %v768_v46  ;;  %v304_v46 = vld [vmem:[%s1696_s25 + $0x280] sm:$0xff]  ;;  %v791_v51 = vmul.f32 %v547_v44, %v303_v43  ;;  %v567_v40 = vld [vmem:[%s1701_s28 + $0x318] sm:$0xff] }
  0x51   : > { %1014 = vst [vmem:[%s1712_s29 + $0x1c8] sm:$0xff] %v769_v49  ;;  %v305_v49 = vld [vmem:[%s1696_s25 + $0x288] sm:$0xff]  ;;  %v792_v54 = vmul.f32 %v548_v47, %v304_v46  ;;  %v568_v43 = vld [vmem:[%s1701_s28 + $0x320] sm:$0xff] }
  0x52   : > { %1015 = vst [vmem:[%s1712_s29 + $0x1d0] sm:$0xff] %v770_v52  ;;  %v306_v52 = vld [vmem:[%s1696_s25 + $0x290] sm:$0xff]  ;;  %v793_v57 = vmul.f32 %v549_v50, %v305_v49  ;;  %v569_v46 = vld [vmem:[%s1701_s28 + $0x328] sm:$0xff] }
  0x53   : > { %1016 = vst.msk [vmem:[%s1712_s29 + $0x1d8] sm:$0xff] %vm959_vm0, %v771_v55  ;;  %v307_v55 = vld [vmem:[%s1696_s25 + $0x298] sm:$0xff]  ;;  %v794_v60 = vmul.f32 %v550_v53, %v306_v52  ;;  %v570_v49 = vld [vmem:[%s1701_s28 + $0x330] sm:$0xff] }
  0x54   : > { %1017 = vst [vmem:[%s1712_s29 + $0x1e0] sm:$0xff] %v772_v58  ;;  %v308_v58 = vld [vmem:[%s1696_s25 + $0x2a0] sm:$0xff]  ;;  %v795_v63 = vmul.f32 %v551_v56, %v307_v55  ;;  %v571_v52 = vld [vmem:[%s1701_s28 + $0x338] sm:$0xff] }
  0x55   : > { %1018 = vst [vmem:[%s1712_s29 + $0x1e8] sm:$0xff] %v773_v61  ;;  %v309_v61 = vld [vmem:[%s1696_s25 + $0x2a8] sm:$0xff]  ;;  %v796_v2 = vmul.f32 %v552_v59, %v308_v58  ;;  %v572_v55 = vld [vmem:[%s1701_s28 + $0x340] sm:$0xff] }
  0x56   : > { %1019 = vst [vmem:[%s1712_s29 + $0x1f0] sm:$0xff] %v774_v0  ;;  %v310_v0 = vld [vmem:[%s1696_s25 + $0x2b0] sm:$0xff]  ;;  %v797_v5 = vmul.f32 %v553_v62, %v309_v61  ;;  %v573_v58 = vld [vmem:[%s1701_s28 + $0x348] sm:$0xff] }
  0x57   : > { %1020 = vst.msk [vmem:[%s1712_s29 + $0x1f8] sm:$0xff] %vm959_vm0, %v775_v3  ;;  %v311_v3 = vld [vmem:[%s1696_s25 + $0x2b8] sm:$0xff]  ;;  %v798_v8 = vmul.f32 %v554_v1, %v310_v0  ;;  %v574_v61 = vld [vmem:[%s1701_s28 + $0x350] sm:$0xff] }
  0x58   : > { %1021 = vst [vmem:[%s1712_s29 + $0x200] sm:$0xff] %v776_v6  ;;  %v312_v6 = vld [vmem:[%s1696_s25 + $0x2c0] sm:$0xff]  ;;  %v799_v11 = vmul.f32 %v555_v4, %v311_v3  ;;  %v575_v0 = vld [vmem:[%s1701_s28 + $0x358] sm:$0xff] }
  0x59   : > { %1022 = vst [vmem:[%s1712_s29 + $0x208] sm:$0xff] %v777_v9  ;;  %v313_v9 = vld [vmem:[%s1696_s25 + $0x2c8] sm:$0xff]  ;;  %v800_v14 = vmul.f32 %v556_v7, %v312_v6  ;;  %v576_v3 = vld [vmem:[%s1701_s28 + $0x360] sm:$0xff] }
  0x5a   : > { %1023 = vst [vmem:[%s1712_s29 + $0x210] sm:$0xff] %v778_v12  ;;  %v314_v12 = vld [vmem:[%s1696_s25 + $0x2d0] sm:$0xff]  ;;  %v801_v17 = vmul.f32 %v557_v10, %v313_v9  ;;  %v577_v6 = vld [vmem:[%s1701_s28 + $0x368] sm:$0xff] }
  0x5b   : > { %1024 = vst.msk [vmem:[%s1712_s29 + $0x218] sm:$0xff] %vm959_vm0, %v779_v15  ;;  %v315_v15 = vld [vmem:[%s1696_s25 + $0x2d8] sm:$0xff]  ;;  %v802_v20 = vmul.f32 %v558_v13, %v314_v12  ;;  %v578_v9 = vld [vmem:[%s1701_s28 + $0x370] sm:$0xff] }
  0x5c   : > { %1025 = vst [vmem:[%s1712_s29 + $0x220] sm:$0xff] %v780_v18  ;;  %v316_v18 = vld [vmem:[%s1696_s25 + $0x2e0] sm:$0xff]  ;;  %v803_v23 = vmul.f32 %v559_v16, %v315_v15  ;;  %v579_v12 = vld [vmem:[%s1701_s28 + $0x378] sm:$0xff] }
  0x5d   : > { %1026 = vst [vmem:[%s1712_s29 + $0x228] sm:$0xff] %v781_v21  ;;  %v317_v21 = vld [vmem:[%s1696_s25 + $0x2e8] sm:$0xff]  ;;  %v804_v26 = vmul.f32 %v560_v19, %v316_v18  ;;  %v580_v15 = vld [vmem:[%s1701_s28 + $0x380] sm:$0xff] }
  0x5e   : > { %1027 = vst [vmem:[%s1712_s29 + $0x230] sm:$0xff] %v782_v24  ;;  %v318_v24 = vld [vmem:[%s1696_s25 + $0x2f0] sm:$0xff]  ;;  %v805_v29 = vmul.f32 %v561_v22, %v317_v21  ;;  %v581_v18 = vld [vmem:[%s1701_s28 + $0x388] sm:$0xff] }
  0x5f   : > { %1028 = vst.msk [vmem:[%s1712_s29 + $0x238] sm:$0xff] %vm959_vm0, %v783_v27  ;;  %v319_v27 = vld [vmem:[%s1696_s25 + $0x2f8] sm:$0xff]  ;;  %v806_v32 = vmul.f32 %v562_v25, %v318_v24  ;;  %v582_v21 = vld [vmem:[%s1701_s28 + $0x390] sm:$0xff] }
  0x60   : > { %1029 = vst [vmem:[%s1712_s29 + $0x240] sm:$0xff] %v784_v30  ;;  %v320_v30 = vld [vmem:[%s1696_s25 + $0x300] sm:$0xff]  ;;  %v807_v35 = vmul.f32 %v563_v28, %v319_v27  ;;  %v583_v24 = vld [vmem:[%s1701_s28 + $0x398] sm:$0xff] }
  0x61   : > { %1030 = vst [vmem:[%s1712_s29 + $0x248] sm:$0xff] %v785_v33  ;;  %v321_v33 = vld [vmem:[%s1696_s25 + $0x308] sm:$0xff]  ;;  %v808_v38 = vmul.f32 %v564_v31, %v320_v30  ;;  %v584_v27 = vld [vmem:[%s1701_s28 + $0x3a0] sm:$0xff] }
  0x62   : > { %1031 = vst [vmem:[%s1712_s29 + $0x250] sm:$0xff] %v786_v36  ;;  %v322_v36 = vld [vmem:[%s1696_s25 + $0x310] sm:$0xff]  ;;  %v809_v41 = vmul.f32 %v565_v34, %v321_v33  ;;  %v585_v30 = vld [vmem:[%s1701_s28 + $0x3a8] sm:$0xff] }
  0x63   : > { %1032 = vst.msk [vmem:[%s1712_s29 + $0x258] sm:$0xff] %vm959_vm0, %v787_v39  ;;  %v323_v39 = vld [vmem:[%s1696_s25 + $0x318] sm:$0xff]  ;;  %v810_v44 = vmul.f32 %v566_v37, %v322_v36  ;;  %v586_v33 = vld [vmem:[%s1701_s28 + $0x3b0] sm:$0xff] }
  0x64   : > { %1033 = vst [vmem:[%s1712_s29 + $0x260] sm:$0xff] %v788_v42  ;;  %v324_v42 = vld [vmem:[%s1696_s25 + $0x320] sm:$0xff]  ;;  %v811_v47 = vmul.f32 %v567_v40, %v323_v39  ;;  %v587_v36 = vld [vmem:[%s1701_s28 + $0x3b8] sm:$0xff] }
  0x65   : > { %1034 = vst [vmem:[%s1712_s29 + $0x268] sm:$0xff] %v789_v45  ;;  %v325_v45 = vld [vmem:[%s1696_s25 + $0x328] sm:$0xff]  ;;  %v812_v50 = vmul.f32 %v568_v43, %v324_v42  ;;  %v588_v39 = vld [vmem:[%s1701_s28 + $0x3c0] sm:$0xff] }
  0x66   : > { %1035 = vst [vmem:[%s1712_s29 + $0x270] sm:$0xff] %v790_v48  ;;  %v326_v48 = vld [vmem:[%s1696_s25 + $0x330] sm:$0xff]  ;;  %v813_v53 = vmul.f32 %v569_v46, %v325_v45  ;;  %v589_v42 = vld [vmem:[%s1701_s28 + $0x3c8] sm:$0xff] }
  0x67   : > { %1036 = vst.msk [vmem:[%s1712_s29 + $0x278] sm:$0xff] %vm959_vm0, %v791_v51  ;;  %v327_v51 = vld [vmem:[%s1696_s25 + $0x338] sm:$0xff]  ;;  %v814_v56 = vmul.f32 %v570_v49, %v326_v48  ;;  %v590_v45 = vld [vmem:[%s1701_s28 + $0x3d0] sm:$0xff] }
  0x68   : > { %1037 = vst [vmem:[%s1712_s29 + $0x280] sm:$0xff] %v792_v54  ;;  %v328_v54 = vld [vmem:[%s1696_s25 + $0x340] sm:$0xff]  ;;  %v815_v59 = vmul.f32 %v571_v52, %v327_v51  ;;  %v591_v48 = vld [vmem:[%s1701_s28 + $0x3d8] sm:$0xff] }
  0x69   : > { %1038 = vst [vmem:[%s1712_s29 + $0x288] sm:$0xff] %v793_v57  ;;  %v329_v57 = vld [vmem:[%s1696_s25 + $0x348] sm:$0xff]  ;;  %v816_v62 = vmul.f32 %v572_v55, %v328_v54  ;;  %v592_v51 = vld [vmem:[%s1701_s28 + $0x3e0] sm:$0xff] }
  0x6a   : > { %1039 = vst [vmem:[%s1712_s29 + $0x290] sm:$0xff] %v794_v60  ;;  %v330_v60 = vld [vmem:[%s1696_s25 + $0x350] sm:$0xff]  ;;  %v817_v1 = vmul.f32 %v573_v58, %v329_v57  ;;  %v593_v54 = vld [vmem:[%s1701_s28 + $0x3e8] sm:$0xff] }
  0x6b   : > { %1040 = vst.msk [vmem:[%s1712_s29 + $0x298] sm:$0xff] %vm959_vm0, %v795_v63  ;;  %v331_v63 = vld [vmem:[%s1696_s25 + $0x358] sm:$0xff]  ;;  %v818_v4 = vmul.f32 %v574_v61, %v330_v60  ;;  %v594_v57 = vld [vmem:[%s1701_s28 + $0x3f0] sm:$0xff] }
  0x6c   : > { %1041 = vst [vmem:[%s1712_s29 + $0x2a0] sm:$0xff] %v796_v2  ;;  %v332_v2 = vld [vmem:[%s1696_s25 + $0x360] sm:$0xff]  ;;  %v819_v7 = vmul.f32 %v575_v0, %v331_v63  ;;  %v595_v60 = vld [vmem:[%s1701_s28 + $0x3f8] sm:$0xff] }
  0x6d   : > { %1042 = vst [vmem:[%s1712_s29 + $0x2a8] sm:$0xff] %v797_v5  ;;  %v333_v5 = vld [vmem:[%s1696_s25 + $0x368] sm:$0xff]  ;;  %v820_v10 = vmul.f32 %v576_v3, %v332_v2  ;;  %v596_v63 = vld [vmem:[%s1701_s28 + $0x400] sm:$0xff] }
  0x6e   : > { %1043 = vst [vmem:[%s1712_s29 + $0x2b0] sm:$0xff] %v798_v8  ;;  %v334_v8 = vld [vmem:[%s1696_s25 + $0x370] sm:$0xff]  ;;  %v821_v13 = vmul.f32 %v577_v6, %v333_v5  ;;  %v597_v2 = vld [vmem:[%s1701_s28 + $0x408] sm:$0xff] }
  0x6f   : > { %1044 = vst.msk [vmem:[%s1712_s29 + $0x2b8] sm:$0xff] %vm959_vm0, %v799_v11  ;;  %v335_v11 = vld [vmem:[%s1696_s25 + $0x378] sm:$0xff]  ;;  %v822_v16 = vmul.f32 %v578_v9, %v334_v8  ;;  %v598_v5 = vld [vmem:[%s1701_s28 + $0x410] sm:$0xff] }
  0x70   : > { %1045 = vst [vmem:[%s1712_s29 + $0x2c0] sm:$0xff] %v800_v14  ;;  %v336_v14 = vld [vmem:[%s1696_s25 + $0x380] sm:$0xff]  ;;  %v823_v19 = vmul.f32 %v579_v12, %v335_v11  ;;  %v599_v8 = vld [vmem:[%s1701_s28 + $0x418] sm:$0xff] }
  0x71   : > { %1046 = vst [vmem:[%s1712_s29 + $0x2c8] sm:$0xff] %v801_v17  ;;  %v337_v17 = vld [vmem:[%s1696_s25 + $0x388] sm:$0xff]  ;;  %v824_v22 = vmul.f32 %v580_v15, %v336_v14  ;;  %v600_v11 = vld [vmem:[%s1701_s28 + $0x420] sm:$0xff] }
  0x72   : > { %1047 = vst [vmem:[%s1712_s29 + $0x2d0] sm:$0xff] %v802_v20  ;;  %v338_v20 = vld [vmem:[%s1696_s25 + $0x390] sm:$0xff]  ;;  %v825_v25 = vmul.f32 %v581_v18, %v337_v17  ;;  %v601_v14 = vld [vmem:[%s1701_s28 + $0x428] sm:$0xff] }
  0x73   : > { %1048 = vst.msk [vmem:[%s1712_s29 + $0x2d8] sm:$0xff] %vm959_vm0, %v803_v23  ;;  %v339_v23 = vld [vmem:[%s1696_s25 + $0x398] sm:$0xff]  ;;  %v826_v28 = vmul.f32 %v582_v21, %v338_v20  ;;  %v602_v17 = vld [vmem:[%s1701_s28 + $0x430] sm:$0xff] }
  0x74   : > { %1049 = vst [vmem:[%s1712_s29 + $0x2e0] sm:$0xff] %v804_v26  ;;  %v340_v26 = vld [vmem:[%s1696_s25 + $0x3a0] sm:$0xff]  ;;  %v827_v31 = vmul.f32 %v583_v24, %v339_v23  ;;  %v603_v20 = vld [vmem:[%s1701_s28 + $0x438] sm:$0xff] }
  0x75   : > { %1050 = vst [vmem:[%s1712_s29 + $0x2e8] sm:$0xff] %v805_v29  ;;  %v341_v29 = vld [vmem:[%s1696_s25 + $0x3a8] sm:$0xff]  ;;  %v828_v34 = vmul.f32 %v584_v27, %v340_v26  ;;  %v604_v23 = vld [vmem:[%s1701_s28 + $0x440] sm:$0xff] }
  0x76   : > { %1051 = vst [vmem:[%s1712_s29 + $0x2f0] sm:$0xff] %v806_v32  ;;  %v342_v32 = vld [vmem:[%s1696_s25 + $0x3b0] sm:$0xff]  ;;  %v829_v37 = vmul.f32 %v585_v30, %v341_v29  ;;  %v605_v26 = vld [vmem:[%s1701_s28 + $0x448] sm:$0xff] }
  0x77   : > { %1052 = vst.msk [vmem:[%s1712_s29 + $0x2f8] sm:$0xff] %vm959_vm0, %v807_v35  ;;  %v343_v35 = vld [vmem:[%s1696_s25 + $0x3b8] sm:$0xff]  ;;  %v830_v40 = vmul.f32 %v586_v33, %v342_v32  ;;  %v606_v29 = vld [vmem:[%s1701_s28 + $0x450] sm:$0xff] }
  0x78   : > { %1053 = vst [vmem:[%s1712_s29 + $0x300] sm:$0xff] %v808_v38  ;;  %v344_v38 = vld [vmem:[%s1696_s25 + $0x3c0] sm:$0xff]  ;;  %v831_v43 = vmul.f32 %v587_v36, %v343_v35  ;;  %v607_v32 = vld [vmem:[%s1701_s28 + $0x458] sm:$0xff] }
  0x79   : > { %1054 = vst [vmem:[%s1712_s29 + $0x308] sm:$0xff] %v809_v41  ;;  %v345_v41 = vld [vmem:[%s1696_s25 + $0x3c8] sm:$0xff]  ;;  %v832_v46 = vmul.f32 %v588_v39, %v344_v38  ;;  %v608_v35 = vld [vmem:[%s1701_s28 + $0x460] sm:$0xff] }
  0x7a   : > { %1055 = vst [vmem:[%s1712_s29 + $0x310] sm:$0xff] %v810_v44  ;;  %v346_v44 = vld [vmem:[%s1696_s25 + $0x3d0] sm:$0xff]  ;;  %v833_v49 = vmul.f32 %v589_v42, %v345_v41  ;;  %v609_v38 = vld [vmem:[%s1701_s28 + $0x468] sm:$0xff] }
  0x7b   : > { %1056 = vst.msk [vmem:[%s1712_s29 + $0x318] sm:$0xff] %vm959_vm0, %v811_v47  ;;  %v347_v47 = vld [vmem:[%s1696_s25 + $0x3d8] sm:$0xff]  ;;  %v834_v52 = vmul.f32 %v590_v45, %v346_v44  ;;  %v610_v41 = vld [vmem:[%s1701_s28 + $0x470] sm:$0xff] }
  0x7c   : > { %1057 = vst [vmem:[%s1712_s29 + $0x320] sm:$0xff] %v812_v50  ;;  %v348_v50 = vld [vmem:[%s1696_s25 + $0x3e0] sm:$0xff]  ;;  %v835_v55 = vmul.f32 %v591_v48, %v347_v47  ;;  %v611_v44 = vld [vmem:[%s1701_s28 + $0x478] sm:$0xff] }
  0x7d   : > { %1058 = vst [vmem:[%s1712_s29 + $0x328] sm:$0xff] %v813_v53  ;;  %v349_v53 = vld [vmem:[%s1696_s25 + $0x3e8] sm:$0xff]  ;;  %v836_v58 = vmul.f32 %v592_v51, %v348_v50  ;;  %v612_v47 = vld [vmem:[%s1701_s28 + $0x480] sm:$0xff] }
  0x7e   : > { %1059 = vst [vmem:[%s1712_s29 + $0x330] sm:$0xff] %v814_v56  ;;  %v350_v56 = vld [vmem:[%s1696_s25 + $0x3f0] sm:$0xff]  ;;  %v837_v61 = vmul.f32 %v593_v54, %v349_v53  ;;  %v613_v50 = vld [vmem:[%s1701_s28 + $0x488] sm:$0xff] }
  0x7f   : > { %1060 = vst.msk [vmem:[%s1712_s29 + $0x338] sm:$0xff] %vm959_vm0, %v815_v59  ;;  %v351_v59 = vld [vmem:[%s1696_s25 + $0x3f8] sm:$0xff]  ;;  %v838_v0 = vmul.f32 %v594_v57, %v350_v56  ;;  %v614_v53 = vld [vmem:[%s1701_s28 + $0x490] sm:$0xff] }
  0x80   : > { %1061 = vst [vmem:[%s1712_s29 + $0x340] sm:$0xff] %v816_v62  ;;  %v352_v62 = vld [vmem:[%s1696_s25 + $0x400] sm:$0xff]  ;;  %v839_v3 = vmul.f32 %v595_v60, %v351_v59  ;;  %v615_v56 = vld [vmem:[%s1701_s28 + $0x498] sm:$0xff] }
  0x81   : > { %1062 = vst [vmem:[%s1712_s29 + $0x348] sm:$0xff] %v817_v1  ;;  %v353_v1 = vld [vmem:[%s1696_s25 + $0x408] sm:$0xff]  ;;  %v840_v6 = vmul.f32 %v596_v63, %v352_v62  ;;  %v616_v59 = vld [vmem:[%s1701_s28 + $0x4a0] sm:$0xff] }
  0x82   : > { %1063 = vst [vmem:[%s1712_s29 + $0x350] sm:$0xff] %v818_v4  ;;  %v354_v4 = vld [vmem:[%s1696_s25 + $0x410] sm:$0xff]  ;;  %v841_v9 = vmul.f32 %v597_v2, %v353_v1  ;;  %v617_v62 = vld [vmem:[%s1701_s28 + $0x4a8] sm:$0xff] }
  0x83   : > { %1064 = vst.msk [vmem:[%s1712_s29 + $0x358] sm:$0xff] %vm959_vm0, %v819_v7  ;;  %v355_v7 = vld [vmem:[%s1696_s25 + $0x418] sm:$0xff]  ;;  %v842_v12 = vmul.f32 %v598_v5, %v354_v4  ;;  %v618_v1 = vld [vmem:[%s1701_s28 + $0x4b0] sm:$0xff] }
  0x84   : > { %1065 = vst [vmem:[%s1712_s29 + $0x360] sm:$0xff] %v820_v10  ;;  %v356_v10 = vld [vmem:[%s1696_s25 + $0x420] sm:$0xff]  ;;  %v843_v15 = vmul.f32 %v599_v8, %v355_v7  ;;  %v619_v4 = vld [vmem:[%s1701_s28 + $0x4b8] sm:$0xff] }
  0x85   : > { %1066 = vst [vmem:[%s1712_s29 + $0x368] sm:$0xff] %v821_v13  ;;  %v357_v13 = vld [vmem:[%s1696_s25 + $0x428] sm:$0xff]  ;;  %v844_v18 = vmul.f32 %v600_v11, %v356_v10  ;;  %v620_v7 = vld [vmem:[%s1701_s28 + $0x4c0] sm:$0xff] }
  0x86   : > { %1067 = vst [vmem:[%s1712_s29 + $0x370] sm:$0xff] %v822_v16  ;;  %v358_v16 = vld [vmem:[%s1696_s25 + $0x430] sm:$0xff]  ;;  %v845_v21 = vmul.f32 %v601_v14, %v357_v13  ;;  %v621_v10 = vld [vmem:[%s1701_s28 + $0x4c8] sm:$0xff] }
  0x87   : > { %1068 = vst.msk [vmem:[%s1712_s29 + $0x378] sm:$0xff] %vm959_vm0, %v823_v19  ;;  %v359_v19 = vld [vmem:[%s1696_s25 + $0x438] sm:$0xff]  ;;  %v846_v24 = vmul.f32 %v602_v17, %v358_v16  ;;  %v622_v13 = vld [vmem:[%s1701_s28 + $0x4d0] sm:$0xff] }
  0x88   : > { %1069 = vst [vmem:[%s1712_s29 + $0x380] sm:$0xff] %v824_v22  ;;  %v360_v22 = vld [vmem:[%s1696_s25 + $0x440] sm:$0xff]  ;;  %v847_v27 = vmul.f32 %v603_v20, %v359_v19  ;;  %v623_v16 = vld [vmem:[%s1701_s28 + $0x4d8] sm:$0xff] }
  0x89   : > { %1070 = vst [vmem:[%s1712_s29 + $0x388] sm:$0xff] %v825_v25  ;;  %v361_v25 = vld [vmem:[%s1696_s25 + $0x448] sm:$0xff]  ;;  %v848_v30 = vmul.f32 %v604_v23, %v360_v22  ;;  %v624_v19 = vld [vmem:[%s1701_s28 + $0x4e0] sm:$0xff] }
  0x8a   : > { %1071 = vst [vmem:[%s1712_s29 + $0x390] sm:$0xff] %v826_v28  ;;  %v362_v28 = vld [vmem:[%s1696_s25 + $0x450] sm:$0xff]  ;;  %v849_v33 = vmul.f32 %v605_v26, %v361_v25  ;;  %v625_v22 = vld [vmem:[%s1701_s28 + $0x4e8] sm:$0xff] }
  0x8b   : > { %1072 = vst.msk [vmem:[%s1712_s29 + $0x398] sm:$0xff] %vm959_vm0, %v827_v31  ;;  %v363_v31 = vld [vmem:[%s1696_s25 + $0x458] sm:$0xff]  ;;  %v850_v36 = vmul.f32 %v606_v29, %v362_v28  ;;  %v626_v25 = vld [vmem:[%s1701_s28 + $0x4f0] sm:$0xff] }
  0x8c   : > { %1073 = vst [vmem:[%s1712_s29 + $0x3a0] sm:$0xff] %v828_v34  ;;  %v364_v34 = vld [vmem:[%s1696_s25 + $0x460] sm:$0xff]  ;;  %v851_v39 = vmul.f32 %v607_v32, %v363_v31  ;;  %v627_v28 = vld [vmem:[%s1701_s28 + $0x4f8] sm:$0xff] }
  0x8d   : > { %1074 = vst [vmem:[%s1712_s29 + $0x3a8] sm:$0xff] %v829_v37  ;;  %v365_v37 = vld [vmem:[%s1696_s25 + $0x468] sm:$0xff]  ;;  %v852_v42 = vmul.f32 %v608_v35, %v364_v34  ;;  %v628_v31 = vld [vmem:[%s1701_s28 + $0x500] sm:$0xff] }
  0x8e   : > { %1075 = vst [vmem:[%s1712_s29 + $0x3b0] sm:$0xff] %v830_v40  ;;  %v366_v40 = vld [vmem:[%s1696_s25 + $0x470] sm:$0xff]  ;;  %v853_v45 = vmul.f32 %v609_v38, %v365_v37  ;;  %v629_v34 = vld [vmem:[%s1701_s28 + $0x508] sm:$0xff] }
  0x8f   : > { %1076 = vst.msk [vmem:[%s1712_s29 + $0x3b8] sm:$0xff] %vm959_vm0, %v831_v43  ;;  %v367_v43 = vld [vmem:[%s1696_s25 + $0x478] sm:$0xff]  ;;  %v854_v48 = vmul.f32 %v610_v41, %v366_v40  ;;  %v630_v37 = vld [vmem:[%s1701_s28 + $0x510] sm:$0xff] }
  0x90   : > { %1077 = vst [vmem:[%s1712_s29 + $0x3c0] sm:$0xff] %v832_v46  ;;  %v368_v46 = vld [vmem:[%s1696_s25 + $0x480] sm:$0xff]  ;;  %v855_v51 = vmul.f32 %v611_v44, %v367_v43  ;;  %v631_v40 = vld [vmem:[%s1701_s28 + $0x518] sm:$0xff] }
  0x91   : > { %1078 = vst [vmem:[%s1712_s29 + $0x3c8] sm:$0xff] %v833_v49  ;;  %v369_v49 = vld [vmem:[%s1696_s25 + $0x488] sm:$0xff]  ;;  %v856_v54 = vmul.f32 %v612_v47, %v368_v46  ;;  %v632_v43 = vld [vmem:[%s1701_s28 + $0x520] sm:$0xff] }
  0x92   : > { %1079 = vst [vmem:[%s1712_s29 + $0x3d0] sm:$0xff] %v834_v52  ;;  %v370_v52 = vld [vmem:[%s1696_s25 + $0x490] sm:$0xff]  ;;  %v857_v57 = vmul.f32 %v613_v50, %v369_v49  ;;  %v633_v46 = vld [vmem:[%s1701_s28 + $0x528] sm:$0xff] }
  0x93   : > { %1080 = vst.msk [vmem:[%s1712_s29 + $0x3d8] sm:$0xff] %vm959_vm0, %v835_v55  ;;  %v371_v55 = vld [vmem:[%s1696_s25 + $0x498] sm:$0xff]  ;;  %v858_v60 = vmul.f32 %v614_v53, %v370_v52  ;;  %v634_v49 = vld [vmem:[%s1701_s28 + $0x530] sm:$0xff] }
  0x94   : > { %1081 = vst [vmem:[%s1712_s29 + $0x3e0] sm:$0xff] %v836_v58  ;;  %v372_v58 = vld [vmem:[%s1696_s25 + $0x4a0] sm:$0xff]  ;;  %v859_v63 = vmul.f32 %v615_v56, %v371_v55  ;;  %v635_v52 = vld [vmem:[%s1701_s28 + $0x538] sm:$0xff] }
  0x95   : > { %1082 = vst [vmem:[%s1712_s29 + $0x3e8] sm:$0xff] %v837_v61  ;;  %v373_v61 = vld [vmem:[%s1696_s25 + $0x4a8] sm:$0xff]  ;;  %v860_v2 = vmul.f32 %v616_v59, %v372_v58  ;;  %v636_v55 = vld [vmem:[%s1701_s28 + $0x540] sm:$0xff] }
  0x96   : > { %1083 = vst [vmem:[%s1712_s29 + $0x3f0] sm:$0xff] %v838_v0  ;;  %v374_v0 = vld [vmem:[%s1696_s25 + $0x4b0] sm:$0xff]  ;;  %v861_v5 = vmul.f32 %v617_v62, %v373_v61  ;;  %v637_v58 = vld [vmem:[%s1701_s28 + $0x548] sm:$0xff] }
  0x97   : > { %1084 = vst.msk [vmem:[%s1712_s29 + $0x3f8] sm:$0xff] %vm959_vm0, %v839_v3  ;;  %v375_v3 = vld [vmem:[%s1696_s25 + $0x4b8] sm:$0xff]  ;;  %v862_v8 = vmul.f32 %v618_v1, %v374_v0  ;;  %v638_v61 = vld [vmem:[%s1701_s28 + $0x550] sm:$0xff] }
  0x98   : > { %1085 = vst [vmem:[%s1712_s29 + $0x400] sm:$0xff] %v840_v6  ;;  %v376_v6 = vld [vmem:[%s1696_s25 + $0x4c0] sm:$0xff]  ;;  %v863_v11 = vmul.f32 %v619_v4, %v375_v3  ;;  %v639_v0 = vld [vmem:[%s1701_s28 + $0x558] sm:$0xff] }
  0x99   : > { %1086 = vst [vmem:[%s1712_s29 + $0x408] sm:$0xff] %v841_v9  ;;  %v377_v9 = vld [vmem:[%s1696_s25 + $0x4c8] sm:$0xff]  ;;  %v864_v14 = vmul.f32 %v620_v7, %v376_v6  ;;  %v640_v3 = vld [vmem:[%s1701_s28 + $0x560] sm:$0xff] }
  0x9a   : > { %1087 = vst [vmem:[%s1712_s29 + $0x410] sm:$0xff] %v842_v12  ;;  %v378_v12 = vld [vmem:[%s1696_s25 + $0x4d0] sm:$0xff]  ;;  %v865_v17 = vmul.f32 %v621_v10, %v377_v9  ;;  %v641_v6 = vld [vmem:[%s1701_s28 + $0x568] sm:$0xff] }
  0x9b   : > { %1088 = vst.msk [vmem:[%s1712_s29 + $0x418] sm:$0xff] %vm959_vm0, %v843_v15  ;;  %v379_v15 = vld [vmem:[%s1696_s25 + $0x4d8] sm:$0xff]  ;;  %v866_v20 = vmul.f32 %v622_v13, %v378_v12  ;;  %v642_v9 = vld [vmem:[%s1701_s28 + $0x570] sm:$0xff] }
  0x9c   : > { %1089 = vst [vmem:[%s1712_s29 + $0x420] sm:$0xff] %v844_v18  ;;  %v380_v18 = vld [vmem:[%s1696_s25 + $0x4e0] sm:$0xff]  ;;  %v867_v23 = vmul.f32 %v623_v16, %v379_v15  ;;  %v643_v12 = vld [vmem:[%s1701_s28 + $0x578] sm:$0xff] }
  0x9d   : > { %1090 = vst [vmem:[%s1712_s29 + $0x428] sm:$0xff] %v845_v21  ;;  %v381_v21 = vld [vmem:[%s1696_s25 + $0x4e8] sm:$0xff]  ;;  %v868_v26 = vmul.f32 %v624_v19, %v380_v18  ;;  %v644_v15 = vld [vmem:[%s1701_s28 + $0x580] sm:$0xff] }
  0x9e   : > { %1091 = vst [vmem:[%s1712_s29 + $0x430] sm:$0xff] %v846_v24  ;;  %v382_v24 = vld [vmem:[%s1696_s25 + $0x4f0] sm:$0xff]  ;;  %v869_v29 = vmul.f32 %v625_v22, %v381_v21  ;;  %v645_v18 = vld [vmem:[%s1701_s28 + $0x588] sm:$0xff] }
  0x9f   : > { %1092 = vst.msk [vmem:[%s1712_s29 + $0x438] sm:$0xff] %vm959_vm0, %v847_v27  ;;  %v383_v27 = vld [vmem:[%s1696_s25 + $0x4f8] sm:$0xff]  ;;  %v870_v32 = vmul.f32 %v626_v25, %v382_v24  ;;  %v646_v21 = vld [vmem:[%s1701_s28 + $0x590] sm:$0xff] }
  0xa0   : > { %1093 = vst [vmem:[%s1712_s29 + $0x440] sm:$0xff] %v848_v30  ;;  %v384_v30 = vld [vmem:[%s1696_s25 + $0x500] sm:$0xff]  ;;  %v871_v35 = vmul.f32 %v627_v28, %v383_v27  ;;  %v647_v24 = vld [vmem:[%s1701_s28 + $0x598] sm:$0xff] }
  0xa1   : > { %1094 = vst [vmem:[%s1712_s29 + $0x448] sm:$0xff] %v849_v33  ;;  %v385_v33 = vld [vmem:[%s1696_s25 + $0x508] sm:$0xff]  ;;  %v872_v38 = vmul.f32 %v628_v31, %v384_v30  ;;  %v648_v27 = vld [vmem:[%s1701_s28 + $0x5a0] sm:$0xff] }
  0xa2   : > { %1095 = vst [vmem:[%s1712_s29 + $0x450] sm:$0xff] %v850_v36  ;;  %v386_v36 = vld [vmem:[%s1696_s25 + $0x510] sm:$0xff]  ;;  %v873_v41 = vmul.f32 %v629_v34, %v385_v33  ;;  %v649_v30 = vld [vmem:[%s1701_s28 + $0x5a8] sm:$0xff] }
  0xa3   : > { %1096 = vst.msk [vmem:[%s1712_s29 + $0x458] sm:$0xff] %vm959_vm0, %v851_v39  ;;  %v387_v39 = vld [vmem:[%s1696_s25 + $0x518] sm:$0xff]  ;;  %v874_v44 = vmul.f32 %v630_v37, %v386_v36  ;;  %v650_v33 = vld [vmem:[%s1701_s28 + $0x5b0] sm:$0xff] }
  0xa4   : > { %1097 = vst [vmem:[%s1712_s29 + $0x460] sm:$0xff] %v852_v42  ;;  %v388_v42 = vld [vmem:[%s1696_s25 + $0x520] sm:$0xff]  ;;  %v875_v47 = vmul.f32 %v631_v40, %v387_v39  ;;  %v651_v36 = vld [vmem:[%s1701_s28 + $0x5b8] sm:$0xff] }
  0xa5   : > { %1098 = vst [vmem:[%s1712_s29 + $0x468] sm:$0xff] %v853_v45  ;;  %v389_v45 = vld [vmem:[%s1696_s25 + $0x528] sm:$0xff]  ;;  %v876_v50 = vmul.f32 %v632_v43, %v388_v42  ;;  %v652_v39 = vld [vmem:[%s1701_s28 + $0x5c0] sm:$0xff] }
  0xa6   : > { %1099 = vst [vmem:[%s1712_s29 + $0x470] sm:$0xff] %v854_v48  ;;  %v390_v48 = vld [vmem:[%s1696_s25 + $0x530] sm:$0xff]  ;;  %v877_v53 = vmul.f32 %v633_v46, %v389_v45  ;;  %v653_v42 = vld [vmem:[%s1701_s28 + $0x5c8] sm:$0xff] }
  0xa7   : > { %1100 = vst.msk [vmem:[%s1712_s29 + $0x478] sm:$0xff] %vm959_vm0, %v855_v51  ;;  %v391_v51 = vld [vmem:[%s1696_s25 + $0x538] sm:$0xff]  ;;  %v878_v56 = vmul.f32 %v634_v49, %v390_v48  ;;  %v654_v45 = vld [vmem:[%s1701_s28 + $0x5d0] sm:$0xff] }
  0xa8   : > { %1101 = vst [vmem:[%s1712_s29 + $0x480] sm:$0xff] %v856_v54  ;;  %v392_v54 = vld [vmem:[%s1696_s25 + $0x540] sm:$0xff]  ;;  %v879_v59 = vmul.f32 %v635_v52, %v391_v51  ;;  %v655_v48 = vld [vmem:[%s1701_s28 + $0x5d8] sm:$0xff] }
  0xa9   : > { %1102 = vst [vmem:[%s1712_s29 + $0x488] sm:$0xff] %v857_v57  ;;  %v393_v57 = vld [vmem:[%s1696_s25 + $0x548] sm:$0xff]  ;;  %v880_v62 = vmul.f32 %v636_v55, %v392_v54  ;;  %v656_v51 = vld [vmem:[%s1701_s28 + $0x5e0] sm:$0xff] }
  0xaa   : > { %1103 = vst [vmem:[%s1712_s29 + $0x490] sm:$0xff] %v858_v60  ;;  %v394_v60 = vld [vmem:[%s1696_s25 + $0x550] sm:$0xff]  ;;  %v881_v1 = vmul.f32 %v637_v58, %v393_v57  ;;  %v657_v54 = vld [vmem:[%s1701_s28 + $0x5e8] sm:$0xff] }
  0xab   : > { %1104 = vst.msk [vmem:[%s1712_s29 + $0x498] sm:$0xff] %vm959_vm0, %v859_v63  ;;  %v395_v63 = vld [vmem:[%s1696_s25 + $0x558] sm:$0xff]  ;;  %v882_v4 = vmul.f32 %v638_v61, %v394_v60  ;;  %v658_v57 = vld [vmem:[%s1701_s28 + $0x5f0] sm:$0xff] }
  0xac   : > { %1105 = vst [vmem:[%s1712_s29 + $0x4a0] sm:$0xff] %v860_v2  ;;  %v396_v2 = vld [vmem:[%s1696_s25 + $0x560] sm:$0xff]  ;;  %v883_v7 = vmul.f32 %v639_v0, %v395_v63  ;;  %v659_v60 = vld [vmem:[%s1701_s28 + $0x5f8] sm:$0xff] }
  0xad   : > { %1106 = vst [vmem:[%s1712_s29 + $0x4a8] sm:$0xff] %v861_v5  ;;  %v397_v5 = vld [vmem:[%s1696_s25 + $0x568] sm:$0xff]  ;;  %v884_v10 = vmul.f32 %v640_v3, %v396_v2  ;;  %v660_v63 = vld [vmem:[%s1701_s28 + $0x600] sm:$0xff] }
  0xae   : > { %1107 = vst [vmem:[%s1712_s29 + $0x4b0] sm:$0xff] %v862_v8  ;;  %v398_v8 = vld [vmem:[%s1696_s25 + $0x570] sm:$0xff]  ;;  %v885_v13 = vmul.f32 %v641_v6, %v397_v5  ;;  %v661_v2 = vld [vmem:[%s1701_s28 + $0x608] sm:$0xff] }
  0xaf   : > { %1108 = vst.msk [vmem:[%s1712_s29 + $0x4b8] sm:$0xff] %vm959_vm0, %v863_v11  ;;  %v399_v11 = vld [vmem:[%s1696_s25 + $0x578] sm:$0xff]  ;;  %v886_v16 = vmul.f32 %v642_v9, %v398_v8  ;;  %v662_v5 = vld [vmem:[%s1701_s28 + $0x610] sm:$0xff] }
  0xb0   : > { %1109 = vst [vmem:[%s1712_s29 + $0x4c0] sm:$0xff] %v864_v14  ;;  %v400_v14 = vld [vmem:[%s1696_s25 + $0x580] sm:$0xff]  ;;  %v887_v19 = vmul.f32 %v643_v12, %v399_v11  ;;  %v663_v8 = vld [vmem:[%s1701_s28 + $0x618] sm:$0xff] }
  0xb1   : > { %1110 = vst [vmem:[%s1712_s29 + $0x4c8] sm:$0xff] %v865_v17  ;;  %v401_v17 = vld [vmem:[%s1696_s25 + $0x588] sm:$0xff]  ;;  %v888_v22 = vmul.f32 %v644_v15, %v400_v14  ;;  %v664_v11 = vld [vmem:[%s1701_s28 + $0x620] sm:$0xff] }
  0xb2   : > { %1111 = vst [vmem:[%s1712_s29 + $0x4d0] sm:$0xff] %v866_v20  ;;  %v402_v20 = vld [vmem:[%s1696_s25 + $0x590] sm:$0xff]  ;;  %v889_v25 = vmul.f32 %v645_v18, %v401_v17  ;;  %v665_v14 = vld [vmem:[%s1701_s28 + $0x628] sm:$0xff] }
  0xb3   : > { %1112 = vst.msk [vmem:[%s1712_s29 + $0x4d8] sm:$0xff] %vm959_vm0, %v867_v23  ;;  %v403_v23 = vld [vmem:[%s1696_s25 + $0x598] sm:$0xff]  ;;  %v890_v28 = vmul.f32 %v646_v21, %v402_v20  ;;  %v666_v17 = vld [vmem:[%s1701_s28 + $0x630] sm:$0xff] }
  0xb4   : > { %1113 = vst [vmem:[%s1712_s29 + $0x4e0] sm:$0xff] %v868_v26  ;;  %v404_v26 = vld [vmem:[%s1696_s25 + $0x5a0] sm:$0xff]  ;;  %v891_v31 = vmul.f32 %v647_v24, %v403_v23  ;;  %v667_v20 = vld [vmem:[%s1701_s28 + $0x638] sm:$0xff] }
  0xb5   : > { %1114 = vst [vmem:[%s1712_s29 + $0x4e8] sm:$0xff] %v869_v29  ;;  %v405_v29 = vld [vmem:[%s1696_s25 + $0x5a8] sm:$0xff]  ;;  %v892_v34 = vmul.f32 %v648_v27, %v404_v26  ;;  %v668_v23 = vld [vmem:[%s1701_s28 + $0x640] sm:$0xff] }
  0xb6   : > { %1115 = vst [vmem:[%s1712_s29 + $0x4f0] sm:$0xff] %v870_v32  ;;  %v406_v32 = vld [vmem:[%s1696_s25 + $0x5b0] sm:$0xff]  ;;  %v893_v37 = vmul.f32 %v649_v30, %v405_v29  ;;  %v669_v26 = vld [vmem:[%s1701_s28 + $0x648] sm:$0xff] }
  0xb7   : > { %1116 = vst.msk [vmem:[%s1712_s29 + $0x4f8] sm:$0xff] %vm959_vm0, %v871_v35  ;;  %v407_v35 = vld [vmem:[%s1696_s25 + $0x5b8] sm:$0xff]  ;;  %v894_v40 = vmul.f32 %v650_v33, %v406_v32  ;;  %v670_v29 = vld [vmem:[%s1701_s28 + $0x650] sm:$0xff] }
  0xb8   : > { %1117 = vst [vmem:[%s1712_s29 + $0x500] sm:$0xff] %v872_v38  ;;  %v408_v38 = vld [vmem:[%s1696_s25 + $0x5c0] sm:$0xff]  ;;  %v895_v43 = vmul.f32 %v651_v36, %v407_v35  ;;  %v671_v32 = vld [vmem:[%s1701_s28 + $0x658] sm:$0xff] }
  0xb9   : > { %1118 = vst [vmem:[%s1712_s29 + $0x508] sm:$0xff] %v873_v41  ;;  %v409_v41 = vld [vmem:[%s1696_s25 + $0x5c8] sm:$0xff]  ;;  %v896_v46 = vmul.f32 %v652_v39, %v408_v38  ;;  %v672_v35 = vld [vmem:[%s1701_s28 + $0x660] sm:$0xff] }
  0xba   : > { %1119 = vst [vmem:[%s1712_s29 + $0x510] sm:$0xff] %v874_v44  ;;  %v410_v44 = vld [vmem:[%s1696_s25 + $0x5d0] sm:$0xff]  ;;  %v897_v49 = vmul.f32 %v653_v42, %v409_v41  ;;  %v673_v38 = vld [vmem:[%s1701_s28 + $0x668] sm:$0xff] }
  0xbb   : > { %1120 = vst.msk [vmem:[%s1712_s29 + $0x518] sm:$0xff] %vm959_vm0, %v875_v47  ;;  %v411_v47 = vld [vmem:[%s1696_s25 + $0x5d8] sm:$0xff]  ;;  %v898_v52 = vmul.f32 %v654_v45, %v410_v44  ;;  %v674_v41 = vld [vmem:[%s1701_s28 + $0x670] sm:$0xff] }
  0xbc   : > { %1121 = vst [vmem:[%s1712_s29 + $0x520] sm:$0xff] %v876_v50  ;;  %v412_v50 = vld [vmem:[%s1696_s25 + $0x5e0] sm:$0xff]  ;;  %v899_v55 = vmul.f32 %v655_v48, %v411_v47  ;;  %v675_v44 = vld [vmem:[%s1701_s28 + $0x678] sm:$0xff] }
  0xbd   : > { %1122 = vst [vmem:[%s1712_s29 + $0x528] sm:$0xff] %v877_v53  ;;  %v413_v53 = vld [vmem:[%s1696_s25 + $0x5e8] sm:$0xff]  ;;  %v900_v58 = vmul.f32 %v656_v51, %v412_v50  ;;  %v676_v47 = vld [vmem:[%s1701_s28 + $0x680] sm:$0xff] }
  0xbe   : > { %1123 = vst [vmem:[%s1712_s29 + $0x530] sm:$0xff] %v878_v56  ;;  %v414_v56 = vld [vmem:[%s1696_s25 + $0x5f0] sm:$0xff]  ;;  %v901_v61 = vmul.f32 %v657_v54, %v413_v53  ;;  %v677_v50 = vld [vmem:[%s1701_s28 + $0x688] sm:$0xff] }
  0xbf   : > { %1124 = vst.msk [vmem:[%s1712_s29 + $0x538] sm:$0xff] %vm959_vm0, %v879_v59  ;;  %v415_v59 = vld [vmem:[%s1696_s25 + $0x5f8] sm:$0xff]  ;;  %v902_v0 = vmul.f32 %v658_v57, %v414_v56  ;;  %v678_v53 = vld [vmem:[%s1701_s28 + $0x690] sm:$0xff] }
  0xc0   : > { %1125 = vst [vmem:[%s1712_s29 + $0x540] sm:$0xff] %v880_v62  ;;  %v416_v62 = vld [vmem:[%s1696_s25 + $0x600] sm:$0xff]  ;;  %v903_v3 = vmul.f32 %v659_v60, %v415_v59  ;;  %v679_v56 = vld [vmem:[%s1701_s28 + $0x698] sm:$0xff] }
  0xc1   : > { %1126 = vst [vmem:[%s1712_s29 + $0x548] sm:$0xff] %v881_v1  ;;  %v417_v1 = vld [vmem:[%s1696_s25 + $0x608] sm:$0xff]  ;;  %v904_v6 = vmul.f32 %v660_v63, %v416_v62  ;;  %v680_v59 = vld [vmem:[%s1701_s28 + $0x6a0] sm:$0xff] }
  0xc2   : > { %1127 = vst [vmem:[%s1712_s29 + $0x550] sm:$0xff] %v882_v4  ;;  %v418_v4 = vld [vmem:[%s1696_s25 + $0x610] sm:$0xff]  ;;  %v905_v9 = vmul.f32 %v661_v2, %v417_v1  ;;  %v681_v62 = vld [vmem:[%s1701_s28 + $0x6a8] sm:$0xff] }
  0xc3   : > { %1128 = vst.msk [vmem:[%s1712_s29 + $0x558] sm:$0xff] %vm959_vm0, %v883_v7  ;;  %v419_v7 = vld [vmem:[%s1696_s25 + $0x618] sm:$0xff]  ;;  %v906_v12 = vmul.f32 %v662_v5, %v418_v4  ;;  %v682_v1 = vld [vmem:[%s1701_s28 + $0x6b0] sm:$0xff] }
  0xc4   : > { %1129 = vst [vmem:[%s1712_s29 + $0x560] sm:$0xff] %v884_v10  ;;  %v420_v10 = vld [vmem:[%s1696_s25 + $0x620] sm:$0xff]  ;;  %v907_v15 = vmul.f32 %v663_v8, %v419_v7  ;;  %v683_v4 = vld [vmem:[%s1701_s28 + $0x6b8] sm:$0xff] }
  0xc5   : > { %1130 = vst [vmem:[%s1712_s29 + $0x568] sm:$0xff] %v885_v13  ;;  %v421_v13 = vld [vmem:[%s1696_s25 + $0x628] sm:$0xff]  ;;  %v908_v18 = vmul.f32 %v664_v11, %v420_v10  ;;  %v684_v7 = vld [vmem:[%s1701_s28 + $0x6c0] sm:$0xff] }
  0xc6   : > { %1131 = vst [vmem:[%s1712_s29 + $0x570] sm:$0xff] %v886_v16  ;;  %v422_v16 = vld [vmem:[%s1696_s25 + $0x630] sm:$0xff]  ;;  %v909_v21 = vmul.f32 %v665_v14, %v421_v13  ;;  %v685_v10 = vld [vmem:[%s1701_s28 + $0x6c8] sm:$0xff] }
  0xc7   : > { %1132 = vst.msk [vmem:[%s1712_s29 + $0x578] sm:$0xff] %vm959_vm0, %v887_v19  ;;  %v423_v19 = vld [vmem:[%s1696_s25 + $0x638] sm:$0xff]  ;;  %v910_v24 = vmul.f32 %v666_v17, %v422_v16  ;;  %v686_v13 = vld [vmem:[%s1701_s28 + $0x6d0] sm:$0xff] }
  0xc8   : > { %1133 = vst [vmem:[%s1712_s29 + $0x580] sm:$0xff] %v888_v22  ;;  %v424_v22 = vld [vmem:[%s1696_s25 + $0x640] sm:$0xff]  ;;  %v911_v27 = vmul.f32 %v667_v20, %v423_v19  ;;  %v687_v16 = vld [vmem:[%s1701_s28 + $0x6d8] sm:$0xff] }
  0xc9   : > { %1134 = vst [vmem:[%s1712_s29 + $0x588] sm:$0xff] %v889_v25  ;;  %v425_v25 = vld [vmem:[%s1696_s25 + $0x648] sm:$0xff]  ;;  %v912_v30 = vmul.f32 %v668_v23, %v424_v22  ;;  %v688_v19 = vld [vmem:[%s1701_s28 + $0x6e0] sm:$0xff] }
  0xca   : > { %1135 = vst [vmem:[%s1712_s29 + $0x590] sm:$0xff] %v890_v28  ;;  %v426_v28 = vld [vmem:[%s1696_s25 + $0x650] sm:$0xff]  ;;  %v913_v33 = vmul.f32 %v669_v26, %v425_v25  ;;  %v689_v22 = vld [vmem:[%s1701_s28 + $0x6e8] sm:$0xff] }
  0xcb   : > { %1136 = vst.msk [vmem:[%s1712_s29 + $0x598] sm:$0xff] %vm959_vm0, %v891_v31  ;;  %v427_v31 = vld [vmem:[%s1696_s25 + $0x658] sm:$0xff]  ;;  %v914_v36 = vmul.f32 %v670_v29, %v426_v28  ;;  %v690_v25 = vld [vmem:[%s1701_s28 + $0x6f0] sm:$0xff] }
  0xcc   : > { %1137 = vst [vmem:[%s1712_s29 + $0x5a0] sm:$0xff] %v892_v34  ;;  %v428_v34 = vld [vmem:[%s1696_s25 + $0x660] sm:$0xff]  ;;  %v915_v39 = vmul.f32 %v671_v32, %v427_v31  ;;  %v691_v28 = vld [vmem:[%s1701_s28 + $0x6f8] sm:$0xff] }
  0xcd   : > { %1138 = vst [vmem:[%s1712_s29 + $0x5a8] sm:$0xff] %v893_v37  ;;  %v429_v37 = vld [vmem:[%s1696_s25 + $0x668] sm:$0xff]  ;;  %v916_v42 = vmul.f32 %v672_v35, %v428_v34  ;;  %v692_v31 = vld [vmem:[%s1701_s28 + $0x700] sm:$0xff] }
  0xce   : > { %1139 = vst [vmem:[%s1712_s29 + $0x5b0] sm:$0xff] %v894_v40  ;;  %v430_v40 = vld [vmem:[%s1696_s25 + $0x670] sm:$0xff]  ;;  %v917_v45 = vmul.f32 %v673_v38, %v429_v37  ;;  %v693_v34 = vld [vmem:[%s1701_s28 + $0x708] sm:$0xff] }
  0xcf   : > { %1140 = vst.msk [vmem:[%s1712_s29 + $0x5b8] sm:$0xff] %vm959_vm0, %v895_v43  ;;  %v431_v43 = vld [vmem:[%s1696_s25 + $0x678] sm:$0xff]  ;;  %v918_v48 = vmul.f32 %v674_v41, %v430_v40  ;;  %v694_v37 = vld [vmem:[%s1701_s28 + $0x710] sm:$0xff] }
  0xd0   : > { %1141 = vst [vmem:[%s1712_s29 + $0x5c0] sm:$0xff] %v896_v46  ;;  %v432_v46 = vld [vmem:[%s1696_s25 + $0x680] sm:$0xff]  ;;  %v919_v51 = vmul.f32 %v675_v44, %v431_v43  ;;  %v695_v40 = vld [vmem:[%s1701_s28 + $0x718] sm:$0xff] }
  0xd1   : > { %1142 = vst [vmem:[%s1712_s29 + $0x5c8] sm:$0xff] %v897_v49  ;;  %v433_v49 = vld [vmem:[%s1696_s25 + $0x688] sm:$0xff]  ;;  %v920_v54 = vmul.f32 %v676_v47, %v432_v46  ;;  %v696_v43 = vld [vmem:[%s1701_s28 + $0x720] sm:$0xff] }
  0xd2   : > { %1143 = vst [vmem:[%s1712_s29 + $0x5d0] sm:$0xff] %v898_v52  ;;  %v434_v52 = vld [vmem:[%s1696_s25 + $0x690] sm:$0xff]  ;;  %v921_v57 = vmul.f32 %v677_v50, %v433_v49  ;;  %v697_v46 = vld [vmem:[%s1701_s28 + $0x728] sm:$0xff] }
  0xd3   : > { %1144 = vst.msk [vmem:[%s1712_s29 + $0x5d8] sm:$0xff] %vm959_vm0, %v899_v55  ;;  %v435_v55 = vld [vmem:[%s1696_s25 + $0x698] sm:$0xff]  ;;  %v922_v60 = vmul.f32 %v678_v53, %v434_v52  ;;  %v698_v49 = vld [vmem:[%s1701_s28 + $0x730] sm:$0xff] }
  0xd4   : > { %1145 = vst [vmem:[%s1712_s29 + $0x5e0] sm:$0xff] %v900_v58  ;;  %v436_v58 = vld [vmem:[%s1696_s25 + $0x6a0] sm:$0xff]  ;;  %v923_v63 = vmul.f32 %v679_v56, %v435_v55  ;;  %v699_v52 = vld [vmem:[%s1701_s28 + $0x738] sm:$0xff] }
  0xd5   : > { %1146 = vst [vmem:[%s1712_s29 + $0x5e8] sm:$0xff] %v901_v61  ;;  %v437_v61 = vld [vmem:[%s1696_s25 + $0x6a8] sm:$0xff]  ;;  %v924_v2 = vmul.f32 %v680_v59, %v436_v58  ;;  %v700_v55 = vld [vmem:[%s1701_s28 + $0x740] sm:$0xff] }
  0xd6   : > { %1147 = vst [vmem:[%s1712_s29 + $0x5f0] sm:$0xff] %v902_v0  ;;  %v438_v0 = vld [vmem:[%s1696_s25 + $0x6b0] sm:$0xff]  ;;  %v925_v5 = vmul.f32 %v681_v62, %v437_v61  ;;  %v701_v58 = vld [vmem:[%s1701_s28 + $0x748] sm:$0xff] }
  0xd7   : > { %1148 = vst.msk [vmem:[%s1712_s29 + $0x5f8] sm:$0xff] %vm959_vm0, %v903_v3  ;;  %v439_v3 = vld [vmem:[%s1696_s25 + $0x6b8] sm:$0xff]  ;;  %v926_v8 = vmul.f32 %v682_v1, %v438_v0  ;;  %v702_v61 = vld [vmem:[%s1701_s28 + $0x750] sm:$0xff] }
  0xd8   : > { %1149 = vst [vmem:[%s1712_s29 + $0x600] sm:$0xff] %v904_v6  ;;  %v440_v6 = vld [vmem:[%s1696_s25 + $0x6c0] sm:$0xff]  ;;  %v927_v11 = vmul.f32 %v683_v4, %v439_v3  ;;  %v703_v0 = vld [vmem:[%s1701_s28 + $0x758] sm:$0xff] }
  0xd9   : > { %1150 = vst [vmem:[%s1712_s29 + $0x608] sm:$0xff] %v905_v9  ;;  %v441_v9 = vld [vmem:[%s1696_s25 + $0x6c8] sm:$0xff]  ;;  %v928_v14 = vmul.f32 %v684_v7, %v440_v6  ;;  %v704_v3 = vld [vmem:[%s1701_s28 + $0x760] sm:$0xff] }
  0xda   : > { %1151 = vst [vmem:[%s1712_s29 + $0x610] sm:$0xff] %v906_v12  ;;  %v442_v12 = vld [vmem:[%s1696_s25 + $0x6d0] sm:$0xff]  ;;  %v929_v17 = vmul.f32 %v685_v10, %v441_v9  ;;  %v705_v6 = vld [vmem:[%s1701_s28 + $0x768] sm:$0xff] }
  0xdb   : > { %1152 = vst.msk [vmem:[%s1712_s29 + $0x618] sm:$0xff] %vm959_vm0, %v907_v15  ;;  %v443_v15 = vld [vmem:[%s1696_s25 + $0x6d8] sm:$0xff]  ;;  %v930_v20 = vmul.f32 %v686_v13, %v442_v12  ;;  %v706_v9 = vld [vmem:[%s1701_s28 + $0x770] sm:$0xff] }
  0xdc   : > { %1153 = vst [vmem:[%s1712_s29 + $0x620] sm:$0xff] %v908_v18  ;;  %v444_v18 = vld [vmem:[%s1696_s25 + $0x6e0] sm:$0xff]  ;;  %v931_v23 = vmul.f32 %v687_v16, %v443_v15  ;;  %v707_v12 = vld [vmem:[%s1701_s28 + $0x778] sm:$0xff] }
  0xdd   : > { %1154 = vst [vmem:[%s1712_s29 + $0x628] sm:$0xff] %v909_v21  ;;  %v445_v21 = vld [vmem:[%s1696_s25 + $0x6e8] sm:$0xff]  ;;  %v932_v26 = vmul.f32 %v688_v19, %v444_v18  ;;  %v708_v15 = vld [vmem:[%s1701_s28 + $0x780] sm:$0xff] }
  0xde   : > { %1155 = vst [vmem:[%s1712_s29 + $0x630] sm:$0xff] %v910_v24  ;;  %v446_v24 = vld [vmem:[%s1696_s25 + $0x6f0] sm:$0xff]  ;;  %v933_v29 = vmul.f32 %v689_v22, %v445_v21  ;;  %v709_v18 = vld [vmem:[%s1701_s28 + $0x788] sm:$0xff] }
  0xdf   : > { %1156 = vst.msk [vmem:[%s1712_s29 + $0x638] sm:$0xff] %vm959_vm0, %v911_v27  ;;  %v447_v27 = vld [vmem:[%s1696_s25 + $0x6f8] sm:$0xff]  ;;  %v934_v32 = vmul.f32 %v690_v25, %v446_v24  ;;  %v710_v21 = vld [vmem:[%s1701_s28 + $0x790] sm:$0xff] }
  0xe0   : > { %1157 = vst [vmem:[%s1712_s29 + $0x640] sm:$0xff] %v912_v30  ;;  %v448_v30 = vld [vmem:[%s1696_s25 + $0x700] sm:$0xff]  ;;  %v935_v35 = vmul.f32 %v691_v28, %v447_v27  ;;  %v711_v24 = vld [vmem:[%s1701_s28 + $0x798] sm:$0xff] }
  0xe1   : > { %1158 = vst [vmem:[%s1712_s29 + $0x648] sm:$0xff] %v913_v33  ;;  %v449_v33 = vld [vmem:[%s1696_s25 + $0x708] sm:$0xff]  ;;  %v936_v38 = vmul.f32 %v692_v31, %v448_v30 }
  0xe2   : > { %1159 = vst [vmem:[%s1712_s29 + $0x650] sm:$0xff] %v914_v36  ;;  %v450_v36 = vld [vmem:[%s1696_s25 + $0x710] sm:$0xff]  ;;  %v937_v41 = vmul.f32 %v693_v34, %v449_v33 }
  0xe3   : > { %1160 = vst.msk [vmem:[%s1712_s29 + $0x658] sm:$0xff] %vm959_vm0, %v915_v39  ;;  %v451_v39 = vld [vmem:[%s1696_s25 + $0x718] sm:$0xff]  ;;  %v938_v44 = vmul.f32 %v694_v37, %v450_v36 }
  0xe4   : > { %1161 = vst [vmem:[%s1712_s29 + $0x660] sm:$0xff] %v916_v42  ;;  %v452_v42 = vld [vmem:[%s1696_s25 + $0x720] sm:$0xff]  ;;  %v939_v47 = vmul.f32 %v695_v40, %v451_v39 }
  0xe5   : > { %1162 = vst [vmem:[%s1712_s29 + $0x668] sm:$0xff] %v917_v45  ;;  %v453_v45 = vld [vmem:[%s1696_s25 + $0x728] sm:$0xff]  ;;  %v940_v50 = vmul.f32 %v696_v43, %v452_v42 }
  0xe6   : > { %1163 = vst [vmem:[%s1712_s29 + $0x670] sm:$0xff] %v918_v48  ;;  %v454_v48 = vld [vmem:[%s1696_s25 + $0x730] sm:$0xff]  ;;  %v941_v53 = vmul.f32 %v697_v46, %v453_v45 }
  0xe7   : > { %1164 = vst.msk [vmem:[%s1712_s29 + $0x678] sm:$0xff] %vm959_vm0, %v919_v51  ;;  %v455_v51 = vld [vmem:[%s1696_s25 + $0x738] sm:$0xff]  ;;  %v942_v56 = vmul.f32 %v698_v49, %v454_v48 }
  0xe8   : > { %1165 = vst [vmem:[%s1712_s29 + $0x680] sm:$0xff] %v920_v54  ;;  %v456_v54 = vld [vmem:[%s1696_s25 + $0x740] sm:$0xff]  ;;  %v943_v59 = vmul.f32 %v699_v52, %v455_v51 }
  0xe9   : > { %1166 = vst [vmem:[%s1712_s29 + $0x688] sm:$0xff] %v921_v57  ;;  %v457_v57 = vld [vmem:[%s1696_s25 + $0x748] sm:$0xff]  ;;  %v944_v62 = vmul.f32 %v700_v55, %v456_v54 }
  0xea   : > { %1167 = vst [vmem:[%s1712_s29 + $0x690] sm:$0xff] %v922_v60  ;;  %v458_v60 = vld [vmem:[%s1696_s25 + $0x750] sm:$0xff]  ;;  %v945_v1 = vmul.f32 %v701_v58, %v457_v57 }
  0xeb   : > { %1168 = vst.msk [vmem:[%s1712_s29 + $0x698] sm:$0xff] %vm959_vm0, %v923_v63  ;;  %v459_v63 = vld [vmem:[%s1696_s25 + $0x758] sm:$0xff]  ;;  %v946_v4 = vmul.f32 %v702_v61, %v458_v60 }
  0xec   : > { %1169 = vst [vmem:[%s1712_s29 + $0x6a0] sm:$0xff] %v924_v2  ;;  %v460_v2 = vld [vmem:[%s1696_s25 + $0x760] sm:$0xff]  ;;  %v947_v7 = vmul.f32 %v703_v0, %v459_v63 }
  0xed   : > { %1170 = vst [vmem:[%s1712_s29 + $0x6a8] sm:$0xff] %v925_v5  ;;  %v461_v5 = vld [vmem:[%s1696_s25 + $0x768] sm:$0xff]  ;;  %v948_v10 = vmul.f32 %v704_v3, %v460_v2 }
  0xee   : > { %1171 = vst [vmem:[%s1712_s29 + $0x6b0] sm:$0xff] %v926_v8  ;;  %v462_v8 = vld [vmem:[%s1696_s25 + $0x770] sm:$0xff]  ;;  %v949_v13 = vmul.f32 %v705_v6, %v461_v5 }
  0xef   : > { %1172 = vst.msk [vmem:[%s1712_s29 + $0x6b8] sm:$0xff] %vm959_vm0, %v927_v11  ;;  %v463_v11 = vld [vmem:[%s1696_s25 + $0x778] sm:$0xff]  ;;  %v950_v16 = vmul.f32 %v706_v9, %v462_v8 }
  0xf0   : > { %1173 = vst [vmem:[%s1712_s29 + $0x6c0] sm:$0xff] %v928_v14  ;;  %v464_v14 = vld [vmem:[%s1696_s25 + $0x780] sm:$0xff]  ;;  %v951_v19 = vmul.f32 %v707_v12, %v463_v11 }
  0xf1   : > { %1174 = vst [vmem:[%s1712_s29 + $0x6c8] sm:$0xff] %v929_v17  ;;  %v465_v17 = vld [vmem:[%s1696_s25 + $0x788] sm:$0xff]  ;;  %v952_v22 = vmul.f32 %v708_v15, %v464_v14 }
  0xf2   : > { %1175 = vst [vmem:[%s1712_s29 + $0x6d0] sm:$0xff] %v930_v20  ;;  %v466_v20 = vld [vmem:[%s1696_s25 + $0x790] sm:$0xff]  ;;  %v953_v25 = vmul.f32 %v709_v18, %v465_v17 }
  0xf3   : > { %1176 = vst.msk [vmem:[%s1712_s29 + $0x6d8] sm:$0xff] %vm959_vm0, %v931_v23  ;;  %v467_v23 = vld [vmem:[%s1696_s25 + $0x798] sm:$0xff] }
  0xf4   : > { %1177 = vst [vmem:[%s1712_s29 + $0x6e0] sm:$0xff] %v932_v26  ;;  %v954_v26 = vmul.f32 %v710_v21, %v466_v20  ;;  %v955_v27 = vmul.f32 %v711_v24, %v467_v23 }
  0xf5   : > { %1178 = vst [vmem:[%s1712_s29 + $0x6e8] sm:$0xff] %v933_v29 }
  0xf6   : > { %1179 = vst [vmem:[%s1712_s29 + $0x6f0] sm:$0xff] %v934_v32 }
  0xf7   : > { %1180 = vst.msk [vmem:[%s1712_s29 + $0x6f8] sm:$0xff] %vm959_vm0, %v935_v35 }
  0xf8   : > { %1181 = vst [vmem:[%s1712_s29 + $0x700] sm:$0xff] %v936_v38 }
  0xf9   : > { %1182 = vst [vmem:[%s1712_s29 + $0x708] sm:$0xff] %v937_v41 }
  0xfa   : > { %1183 = vst [vmem:[%s1712_s29 + $0x710] sm:$0xff] %v938_v44 }
  0xfb   : > { %1184 = vst.msk [vmem:[%s1712_s29 + $0x718] sm:$0xff] %vm959_vm0, %v939_v47 }
  0xfc   : > { %1185 = vst [vmem:[%s1712_s29 + $0x720] sm:$0xff] %v940_v50 }
  0xfd   : > { %1186 = vst [vmem:[%s1712_s29 + $0x728] sm:$0xff] %v941_v53 }
  0xfe   : > { %1187 = vst [vmem:[%s1712_s29 + $0x730] sm:$0xff] %v942_v56 }
  0xff   : > { %1188 = vst.msk [vmem:[%s1712_s29 + $0x738] sm:$0xff] %vm959_vm0, %v943_v59 }
 0x100   : > { %1189 = vst [vmem:[%s1712_s29 + $0x740] sm:$0xff] %v944_v62 }
 0x101   : > { %1190 = vst [vmem:[%s1712_s29 + $0x748] sm:$0xff] %v945_v1 }
 0x102   : > { %1191 = vst [vmem:[%s1712_s29 + $0x750] sm:$0xff] %v946_v4 }
 0x103   : > { %1192 = vst.msk [vmem:[%s1712_s29 + $0x758] sm:$0xff] %vm959_vm0, %v947_v7 }
 0x104   : > { %1193 = vst [vmem:[%s1712_s29 + $0x760] sm:$0xff] %v948_v10 }
 0x105   : > { %1194 = vst [vmem:[%s1712_s29 + $0x768] sm:$0xff] %v949_v13 }
 0x106   : > { %1195 = vst [vmem:[%s1712_s29 + $0x770] sm:$0xff] %v950_v16 }
 0x107   : > { %1196 = vst.msk [vmem:[%s1712_s29 + $0x778] sm:$0xff] %vm959_vm0, %v951_v19  ;;  %1207 = sbr.rel (!%p1684_p4) target bundleno = 332 (0x14c), region = 32 }
 0x108   : > { %1197 = vst [vmem:[%s1712_s29 + $0x780] sm:$0xff] %v952_v22 }
 0x109   : > { %1198 = vst [vmem:[%s1712_s29 + $0x788] sm:$0xff] %v953_v25 }
 0x10a   : > { %1199 = vst [vmem:[%s1712_s29 + $0x790] sm:$0xff] %v954_v26 }
 0x10b   : > { %1200 = vst.msk [vmem:[%s1712_s29 + $0x798] sm:$0xff] %vm959_vm0, %v955_v27 }
 0x10c   : > { %s2673_s30 = smov (!%p1210_p8, %s1209_s30), 61 }
 0x10d   : > { %s1464_s7 = sshll.u32 %s2673_s30, 5 }
 0x10e   : > { %p1450_p9 = scmp.eq.s32.totalorder %s1464_s7, 0 }
 0x10f   : > { %s2511_s8 = sshrl.u32 (!%p1450_p9), %s2673_s30, 3 }
 0x110   : > { %1220 = sbr.rel (%p1450_p9) target bundleno = 332 (0x14c), region = 36  ;;  %p1451_p10 = scmp.le.s32.totalorder (!%p1450_p9), %s2511_s8, 0 }
 0x115   : > { %1387 = sbr.rel (%p1451_p10) target bundleno = 315 (0x13b), region = 87  ;;  %s2662_s9 = smov (!%p1451_p10), %s2505_s6 }
 0x116   : > { %s2663_s11 = smov (!%p1451_p10), %s1712_s29  ;;  %s2520_s12 = smov (!%p1451_p10), 0  }
 0x117   : > { %s2522_s14 = smov (!%p1451_p10), 0  }
 0x11a LB: >> { %v1233_v28 = vld [vmem:[%s1621_s11] sm:$0xff]  ;;  %s1297_s15 = sadd.s32 1, %s1625_s12  ;;  %v1249_v36 = vld [vmem:[%s1621_s11 + $0x8] sm:$0xff]  ;;  %v1265_v44 = vld [vmem:[%s1621_s11 + $0x10] sm:$0xff]  ;;  %s1227_s14 = sadd.s32 1, %s1629_s14   ;;  %s1629_s14 = sphi %s2522_s14, %s1227_s14   ;;  %s1625_s12 = sphi %s2520_s12, %s2666_s12   ;;  %s1621_s11 = sphi %s2663_s11, %s2665_s11   ;;  %s1617_s9 = sphi %s2662_s9, %s2664_s9  }
 0x11b   : >> { %v1235_v29 = vld [vmem:[%s1621_s11 + $0x20] sm:$0xff]  ;;  %1234 = vst [vmem:[%s1617_s9] sm:$0xff] %v1233_v28  ;;  %p1298_p11 = scmp.ge.s32.totalorder %s1297_s15, %s2511_s8  ;;  %v1251_v37 = vld [vmem:[%s1621_s11 + $0x28] sm:$0xff]  ;;  %v1267_v45 = vld [vmem:[%s1621_s11 + $0x30] sm:$0xff]  ;;  %p1226_p12 = scmp.ge.s32.totalorder %s1227_s14, %s2511_s8 }
 0x11c   : >> { %v1237_v30 = vld [vmem:[%s1621_s11 + $0x40] sm:$0xff]  ;;  %1236 = vst [vmem:[%s1617_s9 + $0x20] sm:$0xff] %v1235_v29  ;;  %v1253_v38 = vld [vmem:[%s1621_s11 + $0x48] sm:$0xff]  ;;  %v1269_v46 = vld [vmem:[%s1621_s11 + $0x50] sm:$0xff] }
 0x11d   : >> { %v1239_v31 = vld [vmem:[%s1621_s11 + $0x60] sm:$0xff]  ;;  %1238 = vst [vmem:[%s1617_s9 + $0x40] sm:$0xff] %v1237_v30  ;;  %s2675_s15 = smov (%p1298_p11, %s1297_s15), 0  ;;  %v1255_v39 = vld [vmem:[%s1621_s11 + $0x68] sm:$0xff]  ;;  %v1271_v47 = vld [vmem:[%s1621_s11 + $0x70] sm:$0xff] }
 0x11e   : >> { %v1241_v32 = vld [vmem:[%s1621_s11 + $0x80] sm:$0xff]  ;;  %1240 = vst [vmem:[%s1617_s9 + $0x60] sm:$0xff] %v1239_v31  ;;  %s1452_s17 = sshll.u32 %s2675_s15, 8  ;;  %v1257_v40 = vld [vmem:[%s1621_s11 + $0x88] sm:$0xff]  ;;  %v1273_v48 = vld [vmem:[%s1621_s11 + $0x90] sm:$0xff]  ;;  %s2666_s12 = smov %s2675_s15 }
 0x11f   : >> { %v1243_v33 = vld [vmem:[%s1621_s11 + $0xa0] sm:$0xff]  ;;  %1242 = vst [vmem:[%s1617_s9 + $0x80] sm:$0xff] %v1241_v32  ;;  %s2554_s18 = scalar_lea.vmem %s1712_s29, %s1452_s17 [#allocation2]   ;;  %s2557_s19 = scalar_lea.vmem %s2505_s6, %s1452_s17   ;;  %v1259_v41 = vld [vmem:[%s1621_s11 + $0xa8] sm:$0xff]  ;;  %v1275_v49 = vld [vmem:[%s1621_s11 + $0xb0] sm:$0xff] }
 0x120   : >> { %v1245_v34 = vld [vmem:[%s1621_s11 + $0xc0] sm:$0xff]  ;;  %1244 = vst [vmem:[%s1617_s9 + $0xa0] sm:$0xff] %v1243_v33  ;;  %v1261_v42 = vld [vmem:[%s1621_s11 + $0xc8] sm:$0xff]  ;;  %v1277_v50 = vld [vmem:[%s1621_s11 + $0xd0] sm:$0xff] }
 0x121   : >> { %v1247_v35 = vld [vmem:[%s1621_s11 + $0xe0] sm:$0xff]  ;;  %1246 = vst [vmem:[%s1617_s9 + $0xc0] sm:$0xff] %v1245_v34  ;;  %v1263_v43 = vld [vmem:[%s1621_s11 + $0xe8] sm:$0xff]  ;;  %v1279_v51 = vld [vmem:[%s1621_s11 + $0xf0] sm:$0xff] }
 0x122   : >> { %1248 = vst [vmem:[%s1617_s9 + $0xe0] sm:$0xff] %v1247_v35  ;;  %v1281_v52 = vld [vmem:[%s1621_s11 + $0x18] sm:$0xff] }
 0x123   : >> { %1250 = vst [vmem:[%s1617_s9 + $0x8] sm:$0xff] %v1249_v36  ;;  %v1283_v53 = vld [vmem:[%s1621_s11 + $0x38] sm:$0xff] }
 0x124   : >> { %1252 = vst [vmem:[%s1617_s9 + $0x28] sm:$0xff] %v1251_v37  ;;  %v1285_v54 = vld [vmem:[%s1621_s11 + $0x58] sm:$0xff] }
 0x125   : >> { %1254 = vst [vmem:[%s1617_s9 + $0x48] sm:$0xff] %v1253_v38  ;;  %v1287_v55 = vld [vmem:[%s1621_s11 + $0x78] sm:$0xff] }
 0x126   : >> { %1256 = vst [vmem:[%s1617_s9 + $0x68] sm:$0xff] %v1255_v39  ;;  %v1289_v56 = vld [vmem:[%s1621_s11 + $0x98] sm:$0xff] }
 0x127   : >> { %1258 = vst [vmem:[%s1617_s9 + $0x88] sm:$0xff] %v1257_v40  ;;  %v1291_v57 = vld [vmem:[%s1621_s11 + $0xb8] sm:$0xff] }
 0x128   : >> { %1260 = vst [vmem:[%s1617_s9 + $0xa8] sm:$0xff] %v1259_v41  ;;  %v1293_v58 = vld [vmem:[%s1621_s11 + $0xd8] sm:$0xff] }
 0x129   : >> { %1262 = vst [vmem:[%s1617_s9 + $0xc8] sm:$0xff] %v1261_v42  ;;  %v1295_v59 = vld [vmem:[%s1621_s11 + $0xf8] sm:$0xff]  ;;  %s2665_s11 = smov %s2554_s18 }
 0x12a   : >> { %1264 = vst [vmem:[%s1617_s9 + $0xe8] sm:$0xff] %v1263_v43 }
 0x12b   : >> { %1266 = vst [vmem:[%s1617_s9 + $0x10] sm:$0xff] %v1265_v44 }
 0x12c   : >> { %1268 = vst [vmem:[%s1617_s9 + $0x30] sm:$0xff] %v1267_v45 }
 0x12d   : >> { %1270 = vst [vmem:[%s1617_s9 + $0x50] sm:$0xff] %v1269_v46 }
 0x12e   : >> { %1272 = vst [vmem:[%s1617_s9 + $0x70] sm:$0xff] %v1271_v47 }
 0x12f   : >> { %1274 = vst [vmem:[%s1617_s9 + $0x90] sm:$0xff] %v1273_v48 }
 0x130   : >> { %1276 = vst [vmem:[%s1617_s9 + $0xb0] sm:$0xff] %v1275_v49 }
 0x131   : >> { %1278 = vst [vmem:[%s1617_s9 + $0xd0] sm:$0xff] %v1277_v50 }
 0x132   : >> { %1280 = vst [vmem:[%s1617_s9 + $0xf0] sm:$0xff] %v1279_v51 }
 0x133   : >> { %1282 = vst [vmem:[%s1617_s9 + $0x18] sm:$0xff] %v1281_v52 }
 0x134   : >> { %1284 = vst [vmem:[%s1617_s9 + $0x38] sm:$0xff] %v1283_v53 }
 0x135   : >> { %1286 = vst [vmem:[%s1617_s9 + $0x58] sm:$0xff] %v1285_v54 }
 0x136   : >> { %1288 = vst [vmem:[%s1617_s9 + $0x78] sm:$0xff] %v1287_v55  ;;  %1229 = sbr.rel (!%p1226_p12) target bundleno = 282 (0x11a), region = 93 }
 0x137   : >> { %1290 = vst [vmem:[%s1617_s9 + $0x98] sm:$0xff] %v1289_v56 }
 0x138   : >> { %1292 = vst [vmem:[%s1617_s9 + $0xb8] sm:$0xff] %v1291_v57 }
 0x139   : >> { %1294 = vst [vmem:[%s1617_s9 + $0xd8] sm:$0xff] %v1293_v58 }
 0x13a   : >> { %1296 = vst [vmem:[%s1617_s9 + $0xf8] sm:$0xff] %v1295_v59  ;;  %s2664_s9 = smov %s2557_s19 }
 0x13b PF: > { %s2622_s20 = sand.u32 7, %s2673_s30   ;;  %s1467_s21 = sshll.u32 %s2511_s8, 8 }
 0x13c   : > { %s2626_s22 = scalar_lea.vmem %s1712_s29, %s1467_s21 [#allocation2]   ;;  %s2629_s23 = scalar_lea.vmem %s2505_s6, %s1467_s21  }
 0x13d   : > { %p1457_p13 = scmp.le.s32.totalorder %s2622_s20, 0 }
 0x13e   : > { %s2667_s24 = smov (!%p1457_p13), %s2629_s23  ;;  %s2668_s25 = smov (!%p1457_p13), %s2626_s22 }
 0x13f   : > { %1401 = sbr.rel (%p1457_p13) target bundleno = 332 (0x14c), region = 98  ;;  %s1639_s26 = smov (!%p1457_p13), 0  }
 0x140   : > { %s1643_s27 = smov (!%p1457_p13), 0  }
 0x144 LB: >> { %v1320_v60 = vld [vmem:[%s1637_s25] sm:$0xff]  ;;  %v1322_v61 = vld [vmem:[%s1637_s25 + $0x8] sm:$0xff]  ;;  %v1324_v62 = vld [vmem:[%s1637_s25 + $0x10] sm:$0xff]  ;;  %s1328_s28 = sadd.s32 1, %s1641_s26  ;;  %s1314_s27 = sadd.s32 1, %s1645_s27   ;;  %s1645_s27 = sphi %s1643_s27, %s1314_s27   ;;  %s1641_s26 = sphi %s1639_s26, %s1640_s26   ;;  %s1637_s25 = sphi %s2668_s25, %s1333_s25   ;;  %s1633_s24 = sphi %s2667_s24, %s1334_s24  }
 0x145   : >> { %1321 = vst [vmem:[%s1633_s24] sm:$0xff] %v1320_v60  ;;  %v1326_v63 = vld [vmem:[%s1637_s25 + $0x18] sm:$0xff]  ;;  %p1329_p0 = scmp.ge.s32.totalorder %s1328_s28, %s2622_s20  ;;  %p1313_p1 = scmp.ge.s32.totalorder %s1314_s27, %s2622_s20 }
 0x146   : >> { %1323 = vst [vmem:[%s1633_s24 + $0x8] sm:$0xff] %v1322_v61 }
 0x147   : >> { %1325 = vst [vmem:[%s1633_s24 + $0x10] sm:$0xff] %v1324_v62  ;;  %s2677_s28 = smov (%p1329_p0, %s1328_s28), 0  ;;  %1316 = sbr.rel (!%p1313_p1) target bundleno = 324 (0x144), region = 104 }
 0x148   : >> { %1327 = vst [vmem:[%s1633_s24 + $0x18] sm:$0xff] %v1326_v63  ;;  %s1458_s29 = sshll.u32 %s2677_s28, 5  ;;  %s1640_s26 = smov %s2677_s28  }
 0x149   : >> { %s1333_s25 = scalar_lea.vmem %s2626_s22, %s1458_s29 [#allocation2]   ;;  %s1334_s24 = scalar_lea.vmem %s2629_s23, %s1458_s29  }
 0x14c PF: > { %p9_p2 = scmp.ge.s32.totalorder %s1675_s13, 4   ;;  %s2669_s9 = smov %s1609_s10 }
 0x14d   : > { %s2670_s10 = smov %s1682_s16  ;;  %s2671_s11 = smov %s1675_s13 }
 0x14e   :  { %11 = sbr.rel (!%p9_p2) target bundleno = 2 (0x2), region = 115 }

</bundles_post_ra>
